<compile_context>
chip_gen: v6e
topology: v6e:2x2x1
jax: 0.10.0
libtpu: 0.0.40
codegen_flags: <defaults>
</compile_context>

<pallas_src>
import functools

import jax
import jax.numpy as jnp
from jax.experimental import pallas as pl
from jax.experimental.pallas import tpu as pltpu

DIM = 40
INDIM = DIM + DIM // 2      # 60
MIDDIM = 256                # hidden 1
MIDDIM2 = 2 * MIDDIM        # hidden 2 = 512
OUTDIM = DIM                # 40
OUTDIM_P = 128              # lane-padded output feature dim (40 -> 128)


def _round_up(n, m):
    return ((n + m - 1) // m) * m


def _device_kind():
    try:
        return jax.devices()[0].device_kind.lower()
    except Exception:
        return ""


def _has_two_tensorcores():
    # v7x has 2 TensorCores per chip -> want >= 2 balanced grid blocks.
    return "v7" in _device_kind()


def _default_act_dtype():
    # v6e / v7x have bf16-capable VPU/EUP: bf16 activations halve the largest
    # in-kernel slot (the (tb, 512) tanh) and fold away the pre-matmul packs.
    # v5e (and older) have no bf16 element-wise units -> keep f32 there.
    kind = _device_kind()
    if "v6" in kind or "v7" in kind:
        return jnp.bfloat16
    return jnp.float32


def _mlp_kernel(x_ref, w1_ref, b1_ref, w2_ref, b2_ref, w3_ref, b3_ref, o_ref,
                *, act_dtype):
    # Layer 1: Linear(60 -> 256) + ReLU. bf16 MXU operands, f32 accumulate.
    x = x_ref[...].astype(jnp.bfloat16)
    h1 = jnp.dot(x, w1_ref[...], preferred_element_type=jnp.float32)
    h1 = jnp.maximum(h1.astype(act_dtype) + b1_ref[...], 0).astype(jnp.bfloat16)
    # Layer 2: Linear(256 -> 512) + Tanh (EUP).
    h2 = jnp.dot(h1, w2_ref[...], preferred_element_type=jnp.float32)
    h2 = jnp.tanh(h2.astype(act_dtype) + b2_ref[...]).astype(jnp.bfloat16)
    # Layer 3: Linear(512 -> 128 lane-padded). Lane-dense f32 output store.
    o = jnp.dot(h2, w3_ref[...], preferred_element_type=jnp.float32)
    o_ref[...] = (o + b3_ref[...]).astype(o_ref.dtype)


def prepare_generator_params(w1, b1, w2, b2, w3, b3, act_dtype=None):
    """One-time weight/bias cast + pad, hoisted out of the per-call path.

    w1: (60, 256), b1: (1, 256) or (256,)
    w2: (256, 512), b2: (1, 512) or (512,)
    w3: (512, 40),  b3: (1, 40) or (40,)
    """
    if act_dtype is None:
        act_dtype = _default_act_dtype()
    w1_bf = w1.astype(jnp.bfloat16)
    b1_a = jnp.reshape(b1, (1, MIDDIM)).astype(act_dtype)
    w2_bf = w2.astype(jnp.bfloat16)
    b2_a = jnp.reshape(b2, (1, MIDDIM2)).astype(act_dtype)
    # Zero-pad the output feature dim 40 -> 128 (math unchanged, lane-dense).
    w3_bf = jnp.pad(w3, ((0, 0), (0, OUTDIM_P - OUTDIM))).astype(jnp.bfloat16)
    b3_f = jnp.pad(jnp.reshape(b3, (1, OUTDIM)),
                   ((0, 0), (0, OUTDIM_P - OUTDIM))).astype(jnp.float32)
    return {"arrays": (w1_bf, b1_a, w2_bf, b2_a, w3_bf, b3_f),
            "act_dtype": act_dtype}


def generator_forward(x, params, *, batch_tile=None):
    """Fused 3-layer MLP forward.

    x: (N, 60) float32. params: output of prepare_generator_params().
    Returns (N, 40) float32.
    """
    N, F = x.shape
    assert F == INDIM, f"expected {INDIM} input features, got {F}"
    arrays = params["arrays"]
    act_dtype = params["act_dtype"]

    # --- adaptive batch tiling ------------------------------------------------
    if batch_tile is None:
        n_blocks = pl.cdiv(N, 1024)               # ~1024-row tiles for large N
        if _has_two_tensorcores():
            n_blocks = max(2, n_blocks)           # keep both v7x cores busy
        if n_blocks == 1:
            tb = N                                # single full block, no padding
        else:
            tb = _round_up(pl.cdiv(N, n_blocks), 8)   # balanced, sublane-aligned
    else:
        tb = int(batch_tile)
        n_blocks = pl.cdiv(N, tb)
    n_pad = n_blocks * tb

    x_in = x if n_pad == N else jnp.pad(x, ((0, n_pad - N), (0, 0)))

    kernel = functools.partial(_mlp_kernel, act_dtype=act_dtype)

    out = pl.pallas_call(
        kernel,
        out_shape=jax.ShapeDtypeStruct((n_pad, OUTDIM_P), jnp.float32),
        grid_spec=pltpu.PrefetchScalarGridSpec(
            num_scalar_prefetch=0,
            grid=(n_blocks,),
            in_specs=[
                pl.BlockSpec((tb, INDIM), lambda i: (i, 0)),          # x tile (f32)
                pl.BlockSpec((INDIM, MIDDIM), lambda i: (0, 0)),      # W1 (bf16)
                pl.BlockSpec((1, MIDDIM), lambda i: (0, 0)),          # b1
                pl.BlockSpec((MIDDIM, MIDDIM2), lambda i: (0, 0)),    # W2 (bf16)
                pl.BlockSpec((1, MIDDIM2), lambda i: (0, 0)),         # b2
                pl.BlockSpec((MIDDIM2, OUTDIM_P), lambda i: (0, 0)),  # W3 (bf16)
                pl.BlockSpec((1, OUTDIM_P), lambda i: (0, 0)),        # b3
            ],
            out_specs=pl.BlockSpec((tb, OUTDIM_P), lambda i: (i, 0)),
        ),
        compiler_params=pltpu.CompilerParams(
            dimension_semantics=("parallel",)),
    )(x_in, *arrays)

    return out[:N, :OUTDIM]


def _init_linear(key, fan_in, fan_out):
    """Deterministic init mimicking torch.nn.Linear default (uniform +/- 1/sqrt(fan_in))."""
    kw, kb = jax.random.split(key)
    bound = 1.0 / jnp.sqrt(jnp.float32(fan_in))
    # stored as (in, out) so forward is x @ W + b
    w = jax.random.uniform(kw, (fan_in, fan_out), jnp.float32, -bound, bound)
    b = jax.random.uniform(kb, (1, fan_out), jnp.float32, -bound, bound)
    return w, b


def _reference_forward(x, w1, b1, w2, b2, w3, b3):
    h1 = jnp.maximum(x @ w1 + b1, 0.0)
    h2 = jnp.tanh(h1 @ w2 + b2)
    return h2 @ w3 + b3


if __name__ == "__main__":
    key = jax.random.PRNGKey(0)
    k_x, k1, k2, k3 = jax.random.split(key, 4)

    # Lorenz-96 particle states (+ obs features): (300, 60).
    # 300 is not a multiple of 8/256, exercising the adaptive tiling paths.
    batch = 300
    x = jax.random.normal(k_x, (batch, INDIM), jnp.float32)

    w1, b1 = _init_linear(k1, INDIM, MIDDIM)
    w2, b2 = _init_linear(k2, MIDDIM, MIDDIM2)
    w3, b3 = _init_linear(k3, MIDDIM2, OUTDIM)

    # One-time weight preparation (hoisted out of the per-call path).
    params = prepare_generator_params(w1, b1, w2, b2, w3, b3)

    out = generator_forward(x, params)
    out = jax.block_until_ready(out)

    ref = _reference_forward(x, w1, b1, w2, b2, w3, b3)
    assert out.shape == (batch, OUTDIM)
    # bf16 matmul operands (f32 accumulation) -> loosened tolerance vs f32 ref
    assert jnp.allclose(out, ref, atol=3e-2, rtol=3e-2), "mismatch vs reference"

    print("KERNEL_OK")
</pallas_src>

<mosaic_0001>
module attributes {stable_mosaic.version = 11 : i64} {
  func.func @_mlp_kernel(%arg0: i32, %arg1: memref<300x60xf32, #tpu.memory_space<vmem>>, %arg2: memref<60x256xbf16, #tpu.memory_space<vmem>>, %arg3: memref<1x256xf32, #tpu.memory_space<vmem>>, %arg4: memref<256x512xbf16, #tpu.memory_space<vmem>>, %arg5: memref<1x512xf32, #tpu.memory_space<vmem>>, %arg6: memref<512x128xbf16, #tpu.memory_space<vmem>>, %arg7: memref<1x128xf32, #tpu.memory_space<vmem>>, %arg8: memref<300x128xf32, #tpu.memory_space<vmem>>) attributes {dimension_semantics = [#tpu.dimension_semantics<parallel>], iteration_bounds = array<i64: 1>, scalar_prefetch = 0 : i64, scratch_operands = 0 : i64, tpu.core_type = #tpu.core_type<tc>, window_params = [{transform_indices = @transform_0, window_bounds = array<i64: 300, 60>}, {pipeline_mode = #tpu.pipeline_mode<synchronous>, transform_indices = @transform_1, window_bounds = array<i64: 60, 256>}, {pipeline_mode = #tpu.pipeline_mode<synchronous>, transform_indices = @transform_2, window_bounds = array<i64: 1, 256>}, {pipeline_mode = #tpu.pipeline_mode<synchronous>, transform_indices = @transform_3, window_bounds = array<i64: 256, 512>}, {pipeline_mode = #tpu.pipeline_mode<synchronous>, transform_indices = @transform_4, window_bounds = array<i64: 1, 512>}, {pipeline_mode = #tpu.pipeline_mode<synchronous>, transform_indices = @transform_5, window_bounds = array<i64: 512, 128>}, {pipeline_mode = #tpu.pipeline_mode<synchronous>, transform_indices = @transform_6, window_bounds = array<i64: 1, 128>}, {transform_indices = @transform_7, window_bounds = array<i64: 300, 128>}]} {
    %c0 = arith.constant 0 : index
    %c0_0 = arith.constant 0 : index
    %0 = vector.load %arg1[%c0, %c0_0] : memref<300x60xf32, #tpu.memory_space<vmem>>, vector<300x60xf32>
    %1 = arith.truncf %0 : vector<300x60xf32> to vector<300x60xbf16>
    %c0_1 = arith.constant 0 : index
    %c0_2 = arith.constant 0 : index
    %2 = vector.load %arg2[%c0_1, %c0_2] : memref<60x256xbf16, #tpu.memory_space<vmem>>, vector<60x256xbf16>
    %cst = arith.constant dense<0.000000e+00> : vector<300x256xf32>
    %3 = tpu.matmul %1, %2, %cst {dimension_numbers = #tpu.dot_dimension_numbers<[1], [0], [0], [1], [0, 0, 1, 1], [], []>} : vector<300x60xbf16>, vector<60x256xbf16>, vector<300x256xf32> -> vector<300x256xf32>
    %c0_3 = arith.constant 0 : index
    %c0_4 = arith.constant 0 : index
    %4 = vector.load %arg3[%c0_3, %c0_4] : memref<1x256xf32, #tpu.memory_space<vmem>>, vector<1x256xf32>
    %5 = vector.broadcast %4 : vector<1x256xf32> to vector<300x256xf32>
    %6 = arith.addf %3, %5 : vector<300x256xf32>
    %cst_5 = arith.constant 0.000000e+00 : f32
    %7 = vector.broadcast %cst_5 : f32 to vector<300x256xf32>
    %8 = arith.maximumf %6, %7 : vector<300x256xf32>
    %9 = arith.truncf %8 : vector<300x256xf32> to vector<300x256xbf16>
    %c0_6 = arith.constant 0 : index
    %c0_7 = arith.constant 0 : index
    %10 = vector.load %arg4[%c0_6, %c0_7] : memref<256x512xbf16, #tpu.memory_space<vmem>>, vector<256x512xbf16>
    %cst_8 = arith.constant dense<0.000000e+00> : vector<300x512xf32>
    %11 = tpu.matmul %9, %10, %cst_8 {dimension_numbers = #tpu.dot_dimension_numbers<[1], [0], [0], [1], [0, 0, 1, 1], [], []>} : vector<300x256xbf16>, vector<256x512xbf16>, vector<300x512xf32> -> vector<300x512xf32>
    %c0_9 = arith.constant 0 : index
    %c0_10 = arith.constant 0 : index
    %12 = vector.load %arg5[%c0_9, %c0_10] : memref<1x512xf32, #tpu.memory_space<vmem>>, vector<1x512xf32>
    %13 = vector.broadcast %12 : vector<1x512xf32> to vector<300x512xf32>
    %14 = arith.addf %11, %13 : vector<300x512xf32>
    %15 = math.tanh %14 : vector<300x512xf32>
    %16 = arith.truncf %15 : vector<300x512xf32> to vector<300x512xbf16>
    %c0_11 = arith.constant 0 : index
    %c0_12 = arith.constant 0 : index
    %17 = vector.load %arg6[%c0_11, %c0_12] : memref<512x128xbf16, #tpu.memory_space<vmem>>, vector<512x128xbf16>
    %cst_13 = arith.constant dense<0.000000e+00> : vector<300x128xf32>
    %18 = tpu.matmul %16, %17, %cst_13 {dimension_numbers = #tpu.dot_dimension_numbers<[1], [0], [0], [1], [0, 0, 1, 1], [], []>} : vector<300x512xbf16>, vector<512x128xbf16>, vector<300x128xf32> -> vector<300x128xf32>
    %c0_14 = arith.constant 0 : index
    %c0_15 = arith.constant 0 : index
    %19 = vector.load %arg7[%c0_14, %c0_15] : memref<1x128xf32, #tpu.memory_space<vmem>>, vector<1x128xf32>
    %20 = vector.broadcast %19 : vector<1x128xf32> to vector<300x128xf32>
    %21 = arith.addf %18, %20 : vector<300x128xf32>
    %c0_16 = arith.constant 0 : index
    %c0_17 = arith.constant 0 : index
    %22 = vector.load %arg8[%c0_16, %c0_17] : memref<300x128xf32, #tpu.memory_space<vmem>>, vector<300x128xf32>
    tpu.vector_store %arg8[%c0_16, %c0_17], %21 {strides = array<i32>} : memref<300x128xf32, #tpu.memory_space<vmem>>, vector<300x128xf32>,
    return
  }
  func.func @transform_0(%arg0: i32) -> (i32, i32) {
    %c0_i32 = arith.constant 0 : i32
    %c0_i32_0 = arith.constant 0 : i32
    return %arg0, %c0_i32 : i32, i32
  }
  func.func @transform_1(%arg0: i32) -> (i32, i32) {
    %c0_i32 = arith.constant 0 : i32
    %c0_i32_0 = arith.constant 0 : i32
    %c0_i32_1 = arith.constant 0 : i32
    return %c0_i32, %c0_i32_0 : i32, i32
  }
  func.func @transform_2(%arg0: i32) -> (i32, i32) {
    %c0_i32 = arith.constant 0 : i32
    %c0_i32_0 = arith.constant 0 : i32
    %c0_i32_1 = arith.constant 0 : i32
    return %c0_i32, %c0_i32_0 : i32, i32
  }
  func.func @transform_3(%arg0: i32) -> (i32, i32) {
    %c0_i32 = arith.constant 0 : i32
    %c0_i32_0 = arith.constant 0 : i32
    %c0_i32_1 = arith.constant 0 : i32
    return %c0_i32, %c0_i32_0 : i32, i32
  }
  func.func @transform_4(%arg0: i32) -> (i32, i32) {
    %c0_i32 = arith.constant 0 : i32
    %c0_i32_0 = arith.constant 0 : i32
    %c0_i32_1 = arith.constant 0 : i32
    return %c0_i32, %c0_i32_0 : i32, i32
  }
  func.func @transform_5(%arg0: i32) -> (i32, i32) {
    %c0_i32 = arith.constant 0 : i32
    %c0_i32_0 = arith.constant 0 : i32
    %c0_i32_1 = arith.constant 0 : i32
    return %c0_i32, %c0_i32_0 : i32, i32
  }
  func.func @transform_6(%arg0: i32) -> (i32, i32) {
    %c0_i32 = arith.constant 0 : i32
    %c0_i32_0 = arith.constant 0 : i32
    %c0_i32_1 = arith.constant 0 : i32
    return %c0_i32, %c0_i32_0 : i32, i32
  }
  func.func @transform_7(%arg0: i32) -> (i32, i32) {
    %c0_i32 = arith.constant 0 : i32
    %c0_i32_0 = arith.constant 0 : i32
    return %arg0, %c0_i32 : i32, i32
  }
}

</mosaic_0001>

<bundles_post_ra>
// kernel: tpu_custom_call.1
= control target key start
LH: loop header
LB: loop body
LE: loop exit
PB: predicated region body
PF: predicated region fallthrough
CT: control target
= control target key end

     0   :  { %12 = vsyncpa [#allocation3], 0  ;;  %s3690_s0 = inlined_call_operand.vmem [shape: f32[300,60], index: 0, kind: input, shape index: {}]   ;;  %s3691_s1 = inlined_call_operand.vmem [shape: bf16[60,256], index: 1, kind: input, shape index: {}]   ;;  %s3692_s2 = inlined_call_operand.vmem [shape: f32[1,256], index: 2, kind: input, shape index: {}]   ;;  %s3693_s3 = inlined_call_operand.hbm [shape: bf16[256,512], index: 3, kind: input, shape index: {}]   ;;  %s3694_s4 = inlined_call_operand.vmem [shape: f32[1,512], index: 4, kind: input, shape index: {}]   ;;  %s3695_s5 = inlined_call_operand.vmem [shape: bf16[512,128], index: 5, kind: input, shape index: {}]   ;;  %s3696_s6 = inlined_call_operand.vmem [shape: f32[1,128], index: 6, kind: input, shape index: {}]   ;;  %s3697_s7 = inlined_call_operand.hbm [shape: f32[300,128], index: 7, kind: output, shape index: {}]  }
   0x1   :  { %13 = vsyncpa [#allocation4], 0  ;;  %s2955_s24 = smov [#allocation2]  }
   0x2   :  { %s25_s25 = sshll.u32 %s2955_s24, 4  ;;  %s26_s25 = int_to_ptr.vmem [resolvable:$true] %s25_s25 }
   0x3   :  { %s2919_s26 = scalar_lea.vmem %s26_s25, 8192  ;;  %p2924_p1 = scmp.lt.s32.totalorder %s26_s25, %s26_s25 }
   0x4   :  { %p2920_p0 = scmp.ne.s32.totalorder %s26_s25, %s2919_s26  ;;  %p2925_p2 = scmp.lt.s32.totalorder %s2919_s26, %s2919_s26 }
   0x6   :  { %p2926_p3 = por %p2925_p2, %p2924_p1 }
   0x8   :  { %p2927_p4 = pnand %p2926_p3, %p2920_p0 }
   0xa   :  { %2930 = shalt.err (!%p2927_p4)
}
   0xb   :  { %s2956_s27 = smov 256   ;;  %s2957_s28 = smov 16  }
   0xc   :  { %31 = dma.hbm_to_vmem [thread:$0]  %s3693_s3, 8192, %s26_s25, [#allocation3], %s2956_s27, %s2956_s27, %s2957_s28  }
   0xd   :  { %2951 = dma.done.wait [#allocation3], 8192  }
   0xe   :  { %2952 = vsyncadd [#allocation3], 4294959104  ;;  %v2958_v0 = vmov 0   ;;  %vm215_vm0 = vcmask 1045504   ;;  %v2470_v3 = vld [vmem:[%s3691_s1 + $0x24] ss:$8 sps:$4 sm:$0xff]  }
   0xf   :  { %254 = vmatprep.mubr.bf16.mxu0 %v2958_v0  ;;  %354 = vmatprep.mubr.bf16.mxu1 %v2958_v0  ;;  %v2467_v1 = vld [vmem:[%s3691_s1 + $0x34] ss:$8 sps:$4 sm:$0x3f]   ;;  %v2469_v2 = vld [vmem:[%s3691_s1 + $0x30] ss:$8 sps:$4 sm:$0x3f]  }
  0x10   :  { %2335 = vmatprep.subr.msk.bf16.mxu0 %vm215_vm0, %v2467_v1  ;;  %2452 = vmatprep.subr.msk.bf16.mxu1 %vm215_vm0, %v2467_v1  ;;  %v217_v4 = vsel %vm215_vm0, %v2469_v2, 0  ;;  %v2472_v5 = vld [vmem:[%s3691_s1 + $0x20] ss:$8 sps:$4 sm:$0xff]   ;;  %v2473_v6 = vld [vmem:[%s3691_s1 + $0x14] ss:$8 sps:$4 sm:$0xff]   ;;  %vm157_vm1 = vcmask 490496  }
  0x11   :  { %231 = vmatpush1.bf16.msra.mxu0 %v217_v4  ;;  %2456 = vmatpush1.bf16.msra.mxu1 %v217_v4  ;;  %v2475_v7 = vld [vmem:[%s3691_s1 + $0x10] ss:$8 sps:$4 sm:$0xff]   ;;  %v2476_v8 = vld [vmem:[%s3691_s1 + $0x4] ss:$8 sps:$4 sm:$0xff]   ;;  %v2478_v9 = vld [vmem:[%s3691_s1] ss:$8 sps:$4 sm:$0xff]  }
  0x12   :  { %232 = vmatprep.subr.bf16.mxu0 %v2470_v3  ;;  %2453 = vmatprep.subr.bf16.mxu1 %v2470_v3  ;;  %v42_v10 = vld [vmem:[%s3690_s0] sm:$0xff]  ;;  %v43_v11 = vld [vmem:[%s3690_s0 + $0x8] sm:$0xff]  ;;  %v44_v17 = vld [vmem:[%s3690_s0 + $0x10] sm:$0xff] }
  0x13   :  { %v62_v12 = vld [vmem:[%s3690_s0 + $0xa0] sm:$0xff]  ;;  %v63_v13 = vld [vmem:[%s3690_s0 + $0xa8] sm:$0xff]  ;;  %v80_v14 = vpack.c.bf16 %v43_v11, %v42_v10  ;;  %v45_v18 = vld [vmem:[%s3690_s0 + $0x18] sm:$0xff] }
  0x14   :  { %v90_v15 = vpack.c.bf16 %v63_v13, %v62_v12  ;;  %v2481_v16 = vld [vmem:[#allocation2 + $0xec] ss:$16 sps:$4 sm:$0xff]   ;;  %v64_v19 = vld [vmem:[%s3690_s0 + $0xb0] sm:$0xff]  ;;  %v2479_v20 = vld [vmem:[#allocation2 + $0xe8] ss:$16 sps:$4 sm:$0xff]   ;;  %v81_v26 = vpack.c.bf16 %v45_v18, %v44_v17 }
  0x15   :  { %233 = vmatpush1.bf16.msra.mxu0 %v2472_v5  ;;  %2457 = vmatpush1.bf16.msra.mxu1 %v2472_v5  ;;  %v65_v21 = vld [vmem:[%s3690_s0 + $0xb8] sm:$0xff]  ;;  %v2485_v23 = vld [vmem:[#allocation2 + $0xe0] ss:$16 sps:$4 sm:$0xff]   ;;  %v2487_v24 = vld [vmem:[#allocation2 + $0xe4] ss:$16 sps:$4 sm:$0xff]  }
  0x16   :  { %234 = vmatprep.subr.bf16.mxu0 %v2473_v6  ;;  %2454 = vmatprep.subr.bf16.mxu1 %v2473_v6  ;;  %v2484_v22 = vld [vmem:[#allocation2 + $0xcc] ss:$16 sps:$4 sm:$0xff]   ;;  %v2482_v25 = vld [vmem:[#allocation2 + $0xc8] ss:$16 sps:$4 sm:$0xff]   ;;  %v91_v27 = vpack.c.bf16 %v65_v21, %v64_v19  ;;  %v2493_v29 = vld [vmem:[#allocation2 + $0xc4] ss:$16 sps:$4 sm:$0xff]  }
  0x17   :  { %v2488_v28 = vld [vmem:[#allocation2 + $0xa8] ss:$16 sps:$4 sm:$0xff]   ;;  %v2490_v30 = vld [vmem:[#allocation2 + $0xac] ss:$16 sps:$4 sm:$0xff]   ;;  %v2491_v31 = vld [vmem:[#allocation2 + $0xc0] ss:$16 sps:$4 sm:$0xff]  }
  0x18   :  { %v46_v32 = vld [vmem:[%s3690_s0 + $0x20] sm:$0xff]  ;;  %v47_v33 = vld [vmem:[%s3690_s0 + $0x28] sm:$0xff]  ;;  %v48_v46 = vld [vmem:[%s3690_s0 + $0x30] sm:$0xff] }
  0x19   :  { %235 = vmatpush1.bf16.msra.mxu0 %v2475_v7  ;;  %2458 = vmatpush1.bf16.msra.mxu1 %v2475_v7  ;;  %v2496_v34 = vld [vmem:[#allocation2 + $0xa4] ss:$16 sps:$4 sm:$0xff]   ;;  %v2499_v35 = vld [vmem:[#allocation2 + $0x8c] ss:$16 sps:$4 sm:$0xff]   ;;  %v2494_v38 = vld [vmem:[#allocation2 + $0xa0] ss:$16 sps:$4 sm:$0xff]   ;;  %v82_v41 = vpack.c.bf16 %v47_v33, %v46_v32 }
  0x1a   :  { %236 = vmatprep.subr.bf16.mxu0 %v2476_v8  ;;  %2455 = vmatprep.subr.bf16.mxu1 %v2476_v8  ;;  %v66_v36 = vld [vmem:[%s3690_s0 + $0xc0] sm:$0xff]  ;;  %v67_v37 = vld [vmem:[%s3690_s0 + $0xc8] sm:$0xff]  ;;  %v49_v47 = vld [vmem:[%s3690_s0 + $0x38] sm:$0xff] }
  0x1b   :  { %v2497_v39 = vld [vmem:[#allocation2 + $0x88] ss:$16 sps:$4 sm:$0xff]   ;;  %v2502_v40 = vld [vmem:[#allocation2 + $0x84] ss:$16 sps:$4 sm:$0xff]   ;;  %v92_v42 = vpack.c.bf16 %v67_v37, %v66_v36  ;;  %v2500_v43 = vld [vmem:[#allocation2 + $0x80] ss:$16 sps:$4 sm:$0xff]   ;;  %v83_v55 = vpack.c.bf16 %v49_v47, %v48_v46 }
  0x1c   :  { %v2503_v44 = vld [vmem:[#allocation2 + $0x68] ss:$16 sps:$4 sm:$0xff]   ;;  %v2505_v45 = vld [vmem:[#allocation2 + $0x6c] ss:$16 sps:$4 sm:$0xff]   ;;  %v2508_v48 = vld [vmem:[#allocation2 + $0x64] ss:$16 sps:$4 sm:$0xff]  }
  0x1d   :  { %237 = vmatpush1.bf16.msra.mxu0 %v2478_v9  ;;  %2459 = vmatpush1.bf16.msra.mxu1 %v2478_v9  ;;  %v2511_v49 = vld [vmem:[#allocation2 + $0x4c] ss:$16 sps:$4 sm:$0xff]   ;;  %v68_v50 = vld [vmem:[%s3690_s0 + $0xd0] sm:$0xff]  ;;  %v2509_v53 = vld [vmem:[#allocation2 + $0x48] ss:$16 sps:$4 sm:$0xff]  }
  0x1e   :  { %1188 = vmatprep.subr.bf16.mxu0 %v2481_v16  ;;  %965 = vmatprep.subr.bf16.mxu1 %v2487_v24  ;;  %v69_v51 = vld [vmem:[%s3690_s0 + $0xd8] sm:$0xff]  ;;  %v2506_v52 = vld [vmem:[#allocation2 + $0x60] ss:$16 sps:$4 sm:$0xff]   ;;  %v2514_v54 = vld [vmem:[#allocation2 + $0x44] ss:$16 sps:$4 sm:$0xff]  }
  0x1f   :  { %v93_v56 = vpack.c.bf16 %v69_v51, %v68_v50  ;;  %v2512_v57 = vld [vmem:[#allocation2 + $0x40] ss:$16 sps:$4 sm:$0xff]   ;;  %v2515_v58 = vld [vmem:[#allocation2 + $0x28] ss:$16 sps:$4 sm:$0xff]   ;;  %v2517_v59 = vld [vmem:[#allocation2 + $0x2c] ss:$16 sps:$4 sm:$0xff]  }
  0x20   :  { %2336 = vmatmul.mubr.msk.bf16.vlgmr.msra.gmra.mxu0 %vm157_vm1, %v80_v14  ;;  %2346 = vmatmul.mubr.msk.bf16.vlgmr.msra.gmra.mxu1 %vm157_vm1, %v90_v15  ;;  %v50_v60 = vld [vmem:[%s3690_s0 + $0x40] sm:$0xff]  ;;  %v51_v61 = vld [vmem:[%s3690_s0 + $0x48] sm:$0xff]  ;;  %v52_v11 = vld [vmem:[%s3690_s0 + $0x50] sm:$0xff] }
  0x21   :  { %264 = vmatprep.mubr.bf16.mxu0 %v2958_v0  ;;  %364 = vmatprep.mubr.bf16.mxu1 %v2958_v0  ;;  %v2520_v62 = vld [vmem:[#allocation2 + $0x24] ss:$16 sps:$4 sm:$0xff]   ;;  %v2523_v63 = vld [vmem:[#allocation2 + $0xc] ss:$16 sps:$4 sm:$0xff]   ;;  %v2518_v3 = vld [vmem:[#allocation2 + $0x20] ss:$16 sps:$4 sm:$0xff]   ;;  %v84_v6 = vpack.c.bf16 %v51_v61, %v50_v60 }
  0x22   :  { %1189 = vmatpush1.bf16.msra.mxu0 %v2479_v20  ;;  %966 = vmatpush1.bf16.msra.mxu1 %v2485_v23  ;;  %v70_v1 = vld [vmem:[%s3690_s0 + $0xe0] sm:$0xff]  ;;  %v71_v2 = vld [vmem:[%s3690_s0 + $0xe8] sm:$0xff]  ;;  %v53_v12 = vld [vmem:[%s3690_s0 + $0x58] sm:$0xff] }
  0x23   :  { %1190 = vmatprep.subr.bf16.mxu0 %v2484_v22  ;;  %967 = vmatprep.subr.bf16.mxu1 %v2493_v29  ;;  %v2521_v4 = vld [vmem:[#allocation2 + $0x8] ss:$16 sps:$4 sm:$0xff]   ;;  %v2526_v5 = vld [vmem:[#allocation2 + $0x4] ss:$16 sps:$4 sm:$0xff]   ;;  %v94_v7 = vpack.c.bf16 %v71_v2, %v70_v1  ;;  %v2524_v8 = vld [vmem:[#allocation2] ss:$16 sps:$4 sm:$0xff]   ;;  %v85_v20 = vpack.c.bf16 %v53_v12, %v52_v11 }
  0x24   :  { %v2527_v9 = vld [vmem:[#allocation2 + $0x1e8] ss:$16 sps:$4 sm:$0xff]   ;;  %v2529_v10 = vld [vmem:[#allocation2 + $0x1ec] ss:$16 sps:$4 sm:$0xff]   ;;  %v72_v13 = vld [vmem:[%s3690_s0 + $0xf0] sm:$0xff] }
  0x25   :  { %v73_v14 = vld [vmem:[%s3690_s0 + $0xf8] sm:$0xff]  ;;  %v2532_v15 = vld [vmem:[#allocation2 + $0x1e4] ss:$16 sps:$4 sm:$0xff]   ;;  %v2530_v17 = vld [vmem:[#allocation2 + $0x1e0] ss:$16 sps:$4 sm:$0xff]  }
  0x26   :  { %1191 = vmatpush1.bf16.msra.mxu0 %v2482_v25  ;;  %968 = vmatpush1.bf16.msra.mxu1 %v2491_v31  ;;  %v2535_v16 = vld [vmem:[#allocation2 + $0x1cc] ss:$16 sps:$4 sm:$0xff]   ;;  %v2533_v18 = vld [vmem:[#allocation2 + $0x1c8] ss:$16 sps:$4 sm:$0xff]   ;;  %v2538_v19 = vld [vmem:[#allocation2 + $0x1c4] ss:$16 sps:$4 sm:$0xff]   ;;  %v95_v21 = vpack.c.bf16 %v73_v14, %v72_v13 }
  0x27   :  { %1192 = vmatprep.subr.bf16.mxu0 %v2490_v30  ;;  %969 = vmatprep.subr.bf16.mxu1 %v2496_v34  ;;  %v2536_v22 = vld [vmem:[#allocation2 + $0x1c0] ss:$16 sps:$4 sm:$0xff]   ;;  %v2541_v23 = vld [vmem:[#allocation2 + $0x1ac] ss:$16 sps:$4 sm:$0xff]   ;;  %v2539_v24 = vld [vmem:[#allocation2 + $0x1a8] ss:$16 sps:$4 sm:$0xff]  }
  0x28   :  { %2337 = vmatmul.mubr.msk.bf16.gmra.mxu0 %vm157_vm1, %v81_v26  ;;  %2347 = vmatmul.mubr.msk.bf16.gmra.mxu1 %vm157_vm1, %v91_v27  ;;  %v2544_v25 = vld [vmem:[#allocation2 + $0x1a4] ss:$16 sps:$4 sm:$0xff]   ;;  %v2547_v26 = vld [vmem:[#allocation2 + $0x18c] ss:$16 sps:$4 sm:$0xff]   ;;  %v2542_v31 = vld [vmem:[#allocation2 + $0x1a0] ss:$16 sps:$4 sm:$0xff]  }
  0x29   :  { %274 = vmatprep.mubr.bf16.mxu0 %v2958_v0  ;;  %374 = vmatprep.mubr.bf16.mxu1 %v2958_v0  ;;  %v54_v27 = vld [vmem:[%s3690_s0 + $0x60] sm:$0xff]  ;;  %v75_v30 = vld [vmem:[%s3690_s0 + $0x108] sm:$0xff] }
  0x2a   :  { %1193 = vmatpush1.bf16.msra.mxu0 %v2488_v28  ;;  %970 = vmatpush1.bf16.msra.mxu1 %v2494_v38  ;;  %v55_v28 = vld [vmem:[%s3690_s0 + $0x68] sm:$0xff]  ;;  %v74_v29 = vld [vmem:[%s3690_s0 + $0x100] sm:$0xff] }
  0x2b   :  { %1194 = vmatprep.subr.bf16.mxu0 %v2499_v35  ;;  %971 = vmatprep.subr.bf16.mxu1 %v2502_v40  ;;  %v2545_v32 = vld [vmem:[#allocation2 + $0x188] ss:$16 sps:$4 sm:$0xff]   ;;  %v2550_v33 = vld [vmem:[#allocation2 + $0x184] ss:$16 sps:$4 sm:$0xff]   ;;  %v86_v34 = vpack.c.bf16 %v55_v28, %v54_v27  ;;  %v96_v35 = vpack.c.bf16 %v75_v30, %v74_v29  ;;  %v2548_v36 = vld [vmem:[#allocation2 + $0x180] ss:$16 sps:$4 sm:$0xff]  }
  0x2c   :  { %v2556_v37 = vld [vmem:[#allocation2 + $0x16c] ss:$16 sps:$4 sm:$0xff]   ;;  %v2553_v38 = vld [vmem:[#allocation2 + $0x164] ss:$16 sps:$4 sm:$0xff]   ;;  %v79_v50 = vld [vmem:[%s3690_s0 + $0x128] sm:$0xf] }
  0x2d   :  { %v56_v40 = vld [vmem:[%s3690_s0 + $0x70] sm:$0xff]  ;;  %v58_v47 = vld [vmem:[%s3690_s0 + $0x80] sm:$0xff]  ;;  %v2568_v61 = vld [vmem:[#allocation2 + $0x12c] ss:$16 sps:$4 sm:$0xff]  }
  0x2e   :  { %1195 = vmatpush1.bf16.msra.mxu0 %v2497_v39  ;;  %972 = vmatpush1.bf16.msra.mxu1 %v2500_v43  ;;  %v2554_v39 = vld [vmem:[#allocation2 + $0x168] ss:$16 sps:$4 sm:$0xff]   ;;  %v2565_v60 = vld [vmem:[#allocation2 + $0x124] ss:$16 sps:$4 sm:$0xff]   ;;  %v2574_v2 = vld [vmem:[#allocation2 + $0x10c] ss:$16 sps:$4 sm:$0xff]  }
  0x2f   :  { %1196 = vmatprep.subr.bf16.mxu0 %v2505_v45  ;;  %973 = vmatprep.subr.bf16.mxu1 %v2508_v48  ;;  %v77_v43 = vld [vmem:[%s3690_s0 + $0x118] sm:$0xff]  ;;  %v59_v48 = vld [vmem:[%s3690_s0 + $0x88] sm:$0xff]  ;;  %v2571_v1 = vld [vmem:[#allocation2 + $0x104] ss:$16 sps:$4 sm:$0xff]  }
  0x30   :  { %2338 = vmatmul.mubr.msk.bf16.gmra.mxu0 %vm157_vm1, %v82_v41  ;;  %2348 = vmatmul.mubr.msk.bf16.gmra.mxu1 %vm157_vm1, %v92_v42  ;;  %v57_v41 = vld [vmem:[%s3690_s0 + $0x78] sm:$0xff]  ;;  %v76_v42 = vld [vmem:[%s3690_s0 + $0x110] sm:$0xff]  ;;  %v88_v51 = vpack.c.bf16 %v59_v48, %v58_v47 }
  0x31   :  { %284 = vmatprep.mubr.bf16.mxu0 %v2958_v0  ;;  %384 = vmatprep.mubr.bf16.mxu1 %v2958_v0  ;;  %v87_v45 = vpack.c.bf16 %v57_v41, %v56_v40  ;;  %v97_v46 = vpack.c.bf16 %v77_v43, %v76_v42  ;;  %v2577_v41 = vld [vmem:[%s3695_s5 + $0x30] sm:$0xff]  }
  0x32   :  { %1197 = vmatpush1.bf16.msra.mxu0 %v2503_v44  ;;  %974 = vmatpush1.bf16.msra.mxu1 %v2506_v52  ;;  %v2551_v44 = vld [vmem:[#allocation2 + $0x160] ss:$16 sps:$4 sm:$0xff]  }
  0x33   :  { %1198 = vmatprep.subr.bf16.mxu0 %v2511_v49  ;;  %975 = vmatprep.subr.bf16.mxu1 %v2514_v54  ;;  %v78_v49 = vld [vmem:[%s3690_s0 + $0x120] sm:$0xff]  ;;  %v2578_v42 = vld [vmem:[%s3695_s5 + $0xb0] sm:$0xff]  }
  0x34   :  { %v98_v52 = vpack.c.bf16 %v79_v50, %v78_v49  ;;  %v2559_v54 = vld [vmem:[#allocation2 + $0x144] ss:$16 sps:$4 sm:$0xff]  }
  0x36   :  { %1199 = vmatpush1.bf16.msra.mxu0 %v2509_v53  ;;  %976 = vmatpush1.bf16.msra.mxu1 %v2512_v57  ;;  %v60_v53 = vld [vmem:[%s3690_s0 + $0x90] sm:$0xff] }
  0x37   :  { %1200 = vmatprep.subr.bf16.mxu0 %v2517_v59  ;;  %977 = vmatprep.subr.bf16.mxu1 %v2520_v62  ;;  %v2557_v57 = vld [vmem:[#allocation2 + $0x140] ss:$16 sps:$4 sm:$0xff]  }
  0x38   :  { %2339 = vmatmul.mubr.msk.bf16.gmra.mxu0 %vm157_vm1, %v83_v55  ;;  %2349 = vmatmul.mubr.msk.bf16.gmra.mxu1 %vm157_vm1, %v93_v56  ;;  %v2562_v55 = vld [vmem:[#allocation2 + $0x14c] ss:$16 sps:$4 sm:$0xff]   ;;  %v2563_v62 = vld [vmem:[#allocation2 + $0x120] ss:$16 sps:$4 sm:$0xff]  }
  0x39   :  { %294 = vmatprep.mubr.bf16.mxu0 %v2958_v0  ;;  %394 = vmatprep.mubr.bf16.mxu1 %v2958_v0  ;;  %v61_v56 = vld [vmem:[%s3690_s0 + $0x98] sm:$0xff] }
  0x3a   :  { %1201 = vmatpush1.bf16.msra.mxu0 %v2515_v58  ;;  %978 = vmatpush1.bf16.msra.mxu1 %v2518_v3  ;;  %v2560_v58 = vld [vmem:[#allocation2 + $0x148] ss:$16 sps:$4 sm:$0xff]   ;;  %v89_v59 = vpack.c.bf16 %v61_v56, %v60_v53  ;;  %v2569_v3 = vld [vmem:[#allocation2 + $0x100] ss:$16 sps:$4 sm:$0xff]  }
  0x3b   :  { %1202 = vmatprep.subr.bf16.mxu0 %v2523_v63  ;;  %979 = vmatprep.subr.bf16.mxu1 %v2526_v5  ;;  %v2566_v63 = vld [vmem:[#allocation2 + $0x128] ss:$16 sps:$4 sm:$0xff]   ;;  %v109_v5 = vlaneseq }
  0x3e   :  { %1203 = vmatpush1.bf16.msra.mxu0 %v2521_v4  ;;  %980 = vmatpush1.bf16.msra.mxu1 %v2524_v8  ;;  %v2572_v4 = vld [vmem:[#allocation2 + $0x108] ss:$16 sps:$4 sm:$0xff]  }
  0x3f   :  { %1204 = vmatprep.subr.bf16.mxu0 %v2529_v10  ;;  %981 = vmatprep.subr.bf16.mxu1 %v2532_v15 }
  0x40   :  { %2340 = vmatmul.mubr.msk.bf16.gmra.mxu0 %vm157_vm1, %v84_v6  ;;  %2350 = vmatmul.mubr.msk.bf16.gmra.mxu1 %vm157_vm1, %v94_v7  ;;  %v3183_v6 = vshrl.u32 %v109_v5, 7 }
  0x41   :  { %304 = vmatprep.mubr.bf16.mxu0 %v2958_v0  ;;  %404 = vmatprep.mubr.bf16.mxu1 %v2958_v0 }
  0x42   :  { %1205 = vmatpush2.bf16.msra.mxu0 %v2527_v9  ;;  %982 = vmatpush2.bf16.msra.mxu1 %v2530_v17  ;;  %v115_v7 = vsub.s32 1, %v3183_v6  ;;  %v111_v8 = vsub.s32 0, %v3183_v6  ;;  %v107_v9 = vld [vmem:[%s3692_s2] sm:$0x3] }
  0x43   :  { %1206 = vmatprep.subr.bf16.mxu0 %v2535_v16  ;;  %983 = vmatprep.subr.bf16.mxu1 %v2538_v19 }
  0x44   :  { %v3194_v12 = vrot.slane %v107_v9, %v115_v7  ;;  %v3198_v13 = vrot.slane %v107_v9, %v111_v8 }
  0x46   :  { %1207 = vmatpush2.bf16.msra.mxu0 %v2533_v18  ;;  %984 = vmatpush2.bf16.msra.mxu1 %v2536_v22 }
  0x47   :  { %1208 = vmatprep.subr.bf16.mxu0 %v2541_v23  ;;  %985 = vmatprep.subr.bf16.mxu1 %v2544_v25 }
  0x48   :  { %2341 = vmatmul.mubr.msk.bf16.gmra.mxu0 %vm157_vm1, %v85_v20  ;;  %2351 = vmatmul.mubr.msk.bf16.gmra.mxu1 %vm157_vm1, %v95_v21 }
  0x49   :  { %314 = vmatprep.mubr.bf16.mxu0 %v2958_v0  ;;  %414 = vmatprep.mubr.bf16.mxu1 %v2958_v0 }
  0x4a   :  { %1209 = vmatpush2.bf16.msra.mxu0 %v2539_v24  ;;  %986 = vmatpush2.bf16.msra.mxu1 %v2542_v31  ;;  %v2575_v31 = vld [vmem:[%s3695_s5 + $0x38] sm:$0xff]  }
  0x4b   :  { %1210 = vmatprep.subr.bf16.mxu0 %v2547_v26  ;;  %987 = vmatprep.subr.bf16.mxu1 %v2550_v33 }
  0x4e   :  { %1211 = vmatpush2.bf16.msra.mxu0 %v2545_v32  ;;  %988 = vmatpush2.bf16.msra.mxu1 %v2548_v36  ;;  %v2576_v32 = vld [vmem:[%s3695_s5 + $0xb8] sm:$0xff]  }
  0x4f   :  { %1212 = vmatprep.subr.bf16.mxu0 %v2556_v37  ;;  %989 = vmatprep.subr.bf16.mxu1 %v2553_v38 }
  0x50   :  { %2342 = vmatmul.mubr.msk.bf16.gmra.mxu0 %vm157_vm1, %v86_v34  ;;  %2352 = vmatmul.mubr.msk.bf16.gmra.mxu1 %vm157_vm1, %v96_v35 }
  0x51   :  { %324 = vmatprep.mubr.bf16.mxu0 %v2958_v0  ;;  %424 = vmatprep.mubr.bf16.mxu1 %v2958_v0 }
  0x52   :  { %1213 = vmatpush2.bf16.msra.mxu0 %v2554_v39  ;;  %990 = vmatpush2.bf16.msra.mxu1 %v2551_v44 }
  0x53   :  { %991 = vmatprep.subr.bf16.mxu1 %v2559_v54  ;;  %1214 = vmatprep.subr.bf16.mxu0 %v2562_v55 }
  0x56   :  { %992 = vmatpush2.bf16.msra.mxu1 %v2557_v57  ;;  %1215 = vmatpush2.bf16.msra.mxu0 %v2560_v58 }
  0x57   :  { %993 = vmatprep.subr.bf16.mxu1 %v2565_v60  ;;  %1216 = vmatprep.subr.bf16.mxu0 %v2568_v61  ;;  %v2581_v61 = vld [vmem:[%s3695_s5 + $0x20] sm:$0xff]  }
  0x58   :  { %2343 = vmatmul.mubr.msk.bf16.gmra.mxu0 %vm157_vm1, %v87_v45  ;;  %2353 = vmatmul.mubr.msk.bf16.gmra.mxu1 %vm157_vm1, %v97_v46 }
  0x59   :  { %334 = vmatprep.mubr.bf16.mxu0 %v2958_v0  ;;  %434 = vmatprep.mubr.bf16.mxu1 %v2958_v0 }
  0x5a   :  { %994 = vmatpush2.bf16.msra.mxu1 %v2563_v62  ;;  %1217 = vmatpush2.bf16.msra.mxu0 %v2566_v63  ;;  %v2582_v62 = vld [vmem:[%s3695_s5 + $0xa0] sm:$0xff]  }
  0x5b   :  { %995 = vmatprep.subr.bf16.mxu1 %v2571_v1  ;;  %1218 = vmatprep.subr.bf16.mxu0 %v2574_v2 }
  0x5e   :  { %996 = vmatpush2.bf16.msra.mxu1 %v2569_v3  ;;  %1219 = vmatpush2.bf16.msra.mxu0 %v2572_v4 }
  0x5f   :  { %1902 = vmatprep.subr.bf16.mxu1 %v2958_v0  ;;  %2087 = vmatprep.subr.bf16.mxu0 %v2958_v0 }
  0x60   :  { %2344 = vmatmul.mubr.msk.bf16.gmra.mxu0 %vm157_vm1, %v88_v51  ;;  %2354 = vmatmul.mubr.msk.bf16.gmra.mxu1 %vm157_vm1, %v98_v52  ;;  %v2579_v51 = vld [vmem:[%s3695_s5 + $0x28] sm:$0xff]  }
  0x61   :  { %344 = vmatprep.mubr.bf16.mxu0 %v2958_v0  ;;  %v2580_v52 = vld [vmem:[%s3695_s5 + $0xa8] sm:$0xff]  }
  0x68   :  { %2345 = vmatmul.mubr.msk.bf16.gmra.mxu0 %vm157_vm1, %v89_v59 }
  0xe0   :  { %v256_v10 = vpop.f32.mrf.mxu0  ;;  %v3190_v11 = vpop.f32.mrf.mxu1 }
  0xe1   :  { %v257_v20 = vadd.f32 %v256_v10, %v3198_v13 }
  0xe2   :  { %v258_v14 = vpop.f32.mrf.mxu0  ;;  %v3200_v15 = vpop.f32.mrf.mxu1 }
  0xe3   :  { %v259_v18 = vadd.f32 %v258_v14, %v3194_v12  ;;  %v445_v28 = vmax.f32 %v257_v20, 0.0  ;;  %v2583_v14 = vld [vmem:[%s3695_s5 + $0x18] sm:$0xff]  }
  0xe4   :  { %v260_v16 = vpop.f32.mrf.mxu0  ;;  %v3202_v17 = vpop.f32.mrf.mxu1 }
  0xe5   :  { %v261_v19 = vadd.f32 %v260_v16, %v3198_v13  ;;  %v446_v26 = vmax.f32 %v259_v18, 0.0  ;;  %v2584_v16 = vld [vmem:[%s3695_s5 + $0x98] sm:$0xff]  }
  0xe6   :  { %v262_v21 = vpop.f32.mrf.mxu0  ;;  %v3208_v25 = vpop.f32.mrf.mxu1 }
  0xe7   :  { %v263_v22 = vadd.f32 %v262_v21, %v3194_v12  ;;  %v447_v23 = vmax.f32 %v261_v19, 0.0 }
  0xe8   :  { %v266_v24 = vpop.f32.mrf.mxu0  ;;  %v3216_v35 = vpop.f32.mrf.mxu1 }
  0xe9   :  { %v448_v27 = vmax.f32 %v263_v22, 0.0  ;;  %v521_v33 = vpack.c.bf16 %v447_v23, %v445_v28  ;;  %v267_v38 = vadd.f32 %v266_v24, %v3198_v13  ;;  %v2586_v28 = vld [vmem:[%s3695_s5 + $0x90] sm:$0xff]  }
  0xea   :  { %v268_v29 = vpop.f32.mrf.mxu0  ;;  %v3228_v45 = vpop.f32.mrf.mxu1 }
  0xeb   :  { %v522_v30 = vpack.c.bf16 %v448_v27, %v446_v26  ;;  %v269_v36 = vadd.f32 %v268_v29, %v3194_v12  ;;  %v449_v48 = vmax.f32 %v267_v38, 0.0  ;;  %v2585_v27 = vld [vmem:[%s3695_s5 + $0x10] sm:$0xff]   ;;  %v2587_v38 = vld [vmem:[%s3695_s5 + $0x8] sm:$0xff]  }
  0xec   :  { %v270_v34 = vpop.f32.mrf.mxu0  ;;  %v3238_v55 = vpop.f32.mrf.mxu1 }
  0xed   :  { %v271_v37 = vadd.f32 %v270_v34, %v3198_v13  ;;  %997 = vmatprep.mubr.bf16.mxu1 %v522_v30  ;;  %1220 = vmatprep.mubr.bf16.mxu0 %v522_v30  ;;  %v450_v46 = vmax.f32 %v269_v36, 0.0 }
  0xee   :  { %v272_v39 = vpop.f32.mrf.mxu0  ;;  %998 = vmatmul.mubr.bf16.vlgmr.msra.gmra.mxu1 %v521_v33  ;;  %1221 = vmatmul.mubr.bf16.vlgmr.msra.gmra.mxu0 %v521_v33  ;;  %v3252_v2 = vpop.f32.mrf.mxu1 }
  0xef   :  { %v273_v40 = vadd.f32 %v272_v39, %v3194_v12  ;;  %1903 = vmatpush1.bf16.msra.mxu1 %v2575_v31  ;;  %2088 = vmatpush1.bf16.msra.mxu0 %v2576_v32  ;;  %v451_v43 = vmax.f32 %v271_v37, 0.0  ;;  %v2588_v39 = vld [vmem:[%s3695_s5 + $0x88] sm:$0xff]  }
  0xf0   :  { %v276_v44 = vpop.f32.mrf.mxu0  ;;  %1904 = vmatprep.subr.bf16.mxu1 %v2958_v0  ;;  %2089 = vmatprep.subr.bf16.mxu0 %v2958_v0  ;;  %v3262_v20 = vpop.f32.mrf.mxu1 }
  0xf1   :  { %v452_v47 = vmax.f32 %v273_v40, 0.0  ;;  %v523_v53 = vpack.c.bf16 %v451_v43, %v449_v48  ;;  %v277_v58 = vadd.f32 %v276_v44, %v3198_v13 }
  0xf2   :  { %v278_v49 = vpop.f32.mrf.mxu0  ;;  %v3276_v31 = vpop.f32.mrf.mxu1 }
  0xf3   :  { %v524_v50 = vpack.c.bf16 %v452_v47, %v450_v46  ;;  %1905 = vmatpush1.bf16.msra.mxu1 %v2577_v41  ;;  %2090 = vmatpush1.bf16.msra.mxu0 %v2578_v42  ;;  %v279_v56 = vadd.f32 %v278_v49, %v3194_v12  ;;  %v453_v5 = vmax.f32 %v277_v58, 0.0  ;;  %v2589_v49 = vld [vmem:[%s3695_s5] sm:$0xff]  }
  0xf4   :  { %v280_v54 = vpop.f32.mrf.mxu0  ;;  %1906 = vmatprep.subr.bf16.mxu1 %v2958_v0  ;;  %2091 = vmatprep.subr.bf16.mxu0 %v2958_v0  ;;  %v3286_v42 = vpop.f32.mrf.mxu1 }
  0xf5   :  { %v281_v57 = vadd.f32 %v280_v54, %v3198_v13  ;;  %1007 = vmatprep.mubr.bf16.mxu1 %v524_v50  ;;  %1230 = vmatprep.mubr.bf16.mxu0 %v524_v50  ;;  %v454_v3 = vmax.f32 %v279_v56, 0.0  ;;  %v2590_v50 = vld [vmem:[%s3695_s5 + $0x80] sm:$0xff]  }
  0xf6   :  { %v282_v59 = vpop.f32.mrf.mxu0  ;;  %1008 = vmatmul.mubr.bf16.gmra.mxu1 %v523_v53  ;;  %1231 = vmatmul.mubr.bf16.gmra.mxu0 %v523_v53  ;;  %v3300_v53 = vpop.f32.mrf.mxu1 }
  0xf7   :  { %v283_v60 = vadd.f32 %v282_v59, %v3194_v12  ;;  %1907 = vmatpush1.bf16.msra.mxu1 %v2579_v51  ;;  %2092 = vmatpush1.bf16.msra.mxu0 %v2580_v52  ;;  %v455_v63 = vmax.f32 %v281_v57, 0.0 }
  0xf8   :  { %v286_v1 = vpop.f32.mrf.mxu0  ;;  %1908 = vmatprep.subr.bf16.mxu1 %v2958_v0  ;;  %2093 = vmatprep.subr.bf16.mxu0 %v2958_v0 }
  0xf9   :  { %v456_v4 = vmax.f32 %v283_v60, 0.0  ;;  %v525_v18 = vpack.c.bf16 %v455_v63, %v453_v5  ;;  %v287_v23 = vadd.f32 %v286_v1, %v3198_v13  ;;  %v2591_v60 = vld [vmem:[%s3695_s5 + $0x78] sm:$0xff]   ;;  %v3310_v1 = vpop.f32.mrf.mxu1 }
  0xfa   :  { %v288_v9 = vpop.f32.mrf.mxu0 }
  0xfb   :  { %v526_v10 = vpack.c.bf16 %v456_v4, %v454_v3  ;;  %1909 = vmatpush1.bf16.msra.mxu1 %v2581_v61  ;;  %2094 = vmatpush1.bf16.msra.mxu0 %v2582_v62  ;;  %v289_v21 = vadd.f32 %v288_v9, %v3194_v12  ;;  %v457_v34 = vmax.f32 %v287_v23, 0.0  ;;  %v2592_v61 = vld [vmem:[%s3695_s5 + $0xf8] sm:$0xff]  }
  0xfc   :  { %v290_v19 = vpop.f32.mrf.mxu0  ;;  %1910 = vmatprep.subr.bf16.mxu1 %v2958_v0  ;;  %2095 = vmatprep.subr.bf16.mxu0 %v2958_v0 }
  0xfd   :  { %v291_v22 = vadd.f32 %v290_v19, %v3198_v13  ;;  %1017 = vmatprep.mubr.bf16.mxu1 %v526_v10  ;;  %1240 = vmatprep.mubr.bf16.mxu0 %v526_v10  ;;  %v458_v32 = vmax.f32 %v289_v21, 0.0  ;;  %v3324_v21 = vpop.f32.mrf.mxu1 }
  0xfe   :  { %v292_v24 = vpop.f32.mrf.mxu0  ;;  %1018 = vmatmul.mubr.bf16.gmra.mxu1 %v525_v18  ;;  %1241 = vmatmul.mubr.bf16.gmra.mxu0 %v525_v18 }
  0xff   :  { %v293_v26 = vadd.f32 %v292_v24, %v3194_v12  ;;  %1911 = vmatpush1.bf16.msra.mxu1 %v2583_v14  ;;  %2096 = vmatpush1.bf16.msra.mxu0 %v2584_v16  ;;  %v459_v29 = vmax.f32 %v291_v22, 0.0  ;;  %v2593_v14 = vld [vmem:[%s3695_s5 + $0x70] sm:$0xff]  }
 0x100   :  { %v296_v30 = vpop.f32.mrf.mxu0  ;;  %1912 = vmatprep.subr.bf16.mxu1 %v2958_v0  ;;  %2097 = vmatprep.subr.bf16.mxu0 %v2958_v0  ;;  %v2594_v16 = vld [vmem:[%s3695_s5 + $0xf0] sm:$0xff]  }
 0x101   :  { %v460_v33 = vmax.f32 %v293_v26, 0.0  ;;  %v527_v40 = vpack.c.bf16 %v459_v29, %v457_v34  ;;  %v297_v46 = vadd.f32 %v296_v30, %v3198_v13  ;;  %v2596_v29 = vld [vmem:[%s3695_s5 + $0xe8] sm:$0xff]  }
 0x102   :  { %v298_v36 = vpop.f32.mrf.mxu0 }
 0x103   :  { %v528_v37 = vpack.c.bf16 %v460_v33, %v458_v32  ;;  %1913 = vmatpush1.bf16.msra.mxu1 %v2585_v27  ;;  %2098 = vmatpush1.bf16.msra.mxu0 %v2586_v28  ;;  %v299_v43 = vadd.f32 %v298_v36, %v3194_v12  ;;  %v461_v57 = vmax.f32 %v297_v46, 0.0  ;;  %v2595_v28 = vld [vmem:[%s3695_s5 + $0x68] sm:$0xff]   ;;  %v3334_v33 = vpop.f32.mrf.mxu1 }
 0x104   :  { %v300_v41 = vpop.f32.mrf.mxu0  ;;  %1914 = vmatprep.subr.bf16.mxu1 %v2958_v0  ;;  %2099 = vmatprep.subr.bf16.mxu0 %v2958_v0 }
 0x105   :  { %v301_v44 = vadd.f32 %v300_v41, %v3198_v13  ;;  %1027 = vmatprep.mubr.bf16.mxu1 %v528_v37  ;;  %1250 = vmatprep.mubr.bf16.mxu0 %v528_v37  ;;  %v462_v54 = vmax.f32 %v299_v43, 0.0  ;;  %v2598_v41 = vld [vmem:[%s3695_s5 + $0xe0] sm:$0xff]   ;;  %v3348_v46 = vpop.f32.mrf.mxu1 }
 0x106   :  { %v302_v47 = vpop.f32.mrf.mxu0  ;;  %1028 = vmatmul.mubr.bf16.gmra.mxu1 %v527_v40  ;;  %1251 = vmatmul.mubr.bf16.gmra.mxu0 %v527_v40  ;;  %v2597_v40 = vld [vmem:[%s3695_s5 + $0x60] sm:$0xff]  }
 0x107   :  { %v303_v48 = vadd.f32 %v302_v47, %v3194_v12  ;;  %1915 = vmatpush1.bf16.msra.mxu1 %v2587_v38  ;;  %2100 = vmatpush1.bf16.msra.mxu0 %v2588_v39  ;;  %v463_v51 = vmax.f32 %v301_v44, 0.0 }
 0x108   :  { %v306_v52 = vpop.f32.mrf.mxu0  ;;  %1916 = vmatprep.subr.bf16.mxu1 %v2958_v0  ;;  %2101 = vmatprep.subr.bf16.mxu0 %v2958_v0 }
 0x109   :  { %v464_v56 = vmax.f32 %v303_v48, 0.0  ;;  %v529_v62 = vpack.c.bf16 %v463_v51, %v461_v57  ;;  %v307_v5 = vadd.f32 %v306_v52, %v3198_v13  ;;  %v2599_v52 = vld [vmem:[%s3695_s5 + $0x58] sm:$0xff]  }
 0x10a   :  { %v308_v58 = vpop.f32.mrf.mxu0 }
 0x10b   :  { %v530_v59 = vpack.c.bf16 %v464_v56, %v462_v54  ;;  %1917 = vmatpush1.bf16.msra.mxu1 %v2589_v49  ;;  %2102 = vmatpush1.bf16.msra.mxu0 %v2590_v50  ;;  %v309_v3 = vadd.f32 %v308_v58, %v3194_v12  ;;  %v465_v24 = vmax.f32 %v307_v5, 0.0  ;;  %v2600_v54 = vld [vmem:[%s3695_s5 + $0xd8] sm:$0xff]   ;;  %v3358_v58 = vpop.f32.mrf.mxu1 }
 0x10c   :  { %v310_v63 = vpop.f32.mrf.mxu0  ;;  %1918 = vmatprep.subr.bf16.mxu1 %v2958_v0  ;;  %2103 = vmatprep.subr.bf16.mxu0 %v2958_v0 }
 0x10d   :  { %v311_v4 = vadd.f32 %v310_v63, %v3198_v13  ;;  %1037 = vmatprep.mubr.bf16.mxu1 %v530_v59  ;;  %1260 = vmatprep.mubr.bf16.mxu0 %v530_v59  ;;  %v466_v22 = vmax.f32 %v309_v3, 0.0  ;;  %v2601_v3 = vld [vmem:[%s3695_s5 + $0x50] sm:$0xff]  }
 0x10e   :  { %v312_v9 = vpop.f32.mrf.mxu0  ;;  %1038 = vmatmul.mubr.bf16.gmra.mxu1 %v529_v62  ;;  %1261 = vmatmul.mubr.bf16.gmra.mxu0 %v529_v62 }
 0x10f   :  { %v313_v10 = vadd.f32 %v312_v9, %v3194_v12  ;;  %1919 = vmatpush2.bf16.msra.mxu1 %v2591_v60  ;;  %2104 = vmatpush2.bf16.msra.mxu0 %v2592_v61  ;;  %v467_v18 = vmax.f32 %v311_v4, 0.0  ;;  %v3369_v9 = vpop.f32.mrf.mxu1 }
 0x110   :  { %v316_v19 = vpop.f32.mrf.mxu0  ;;  %1920 = vmatprep.subr.bf16.mxu1 %v2958_v0  ;;  %2105 = vmatprep.subr.bf16.mxu0 %v2958_v0 }
 0x111   :  { %v468_v23 = vmax.f32 %v313_v10, 0.0  ;;  %v531_v30 = vpack.c.bf16 %v467_v18, %v465_v24  ;;  %v317_v37 = vadd.f32 %v316_v19, %v3198_v13  ;;  %v3373_v24 = vpop.f32.mrf.mxu1 }
 0x112   :  { %v318_v26 = vpop.f32.mrf.mxu0 }
 0x113   :  { %v532_v27 = vpack.c.bf16 %v468_v23, %v466_v22  ;;  %1921 = vmatpush2.bf16.msra.mxu1 %v2593_v14  ;;  %2106 = vmatpush2.bf16.msra.mxu0 %v2594_v16  ;;  %v319_v34 = vadd.f32 %v318_v26, %v3194_v12  ;;  %v469_v49 = vmax.f32 %v317_v37, 0.0 }
 0x114   :  { %v320_v32 = vpop.f32.mrf.mxu0  ;;  %1922 = vmatprep.subr.bf16.mxu1 %v2958_v0  ;;  %2107 = vmatprep.subr.bf16.mxu0 %v2958_v0 }
 0x115   :  { %v321_v36 = vadd.f32 %v320_v32, %v3198_v13  ;;  %1047 = vmatprep.mubr.bf16.mxu1 %v532_v27  ;;  %1270 = vmatprep.mubr.bf16.mxu0 %v532_v27  ;;  %v470_v47 = vmax.f32 %v319_v34, 0.0 }
 0x116   :  { %v322_v38 = vpop.f32.mrf.mxu0  ;;  %1048 = vmatmul.mubr.bf16.gmra.mxu1 %v531_v30  ;;  %1271 = vmatmul.mubr.bf16.gmra.mxu0 %v531_v30 }
 0x117   :  { %v323_v39 = vadd.f32 %v322_v38, %v3194_v12  ;;  %1923 = vmatpush2.bf16.msra.mxu1 %v2595_v28  ;;  %2108 = vmatpush2.bf16.msra.mxu0 %v2596_v29  ;;  %v471_v43 = vmax.f32 %v321_v36, 0.0  ;;  %v3380_v36 = vpop.f32.mrf.mxu1 }
 0x118   :  { %v326_v44 = vpop.f32.mrf.mxu0  ;;  %1924 = vmatprep.subr.bf16.mxu1 %v2958_v0  ;;  %2109 = vmatprep.subr.bf16.mxu0 %v2958_v0 }
 0x119   :  { %v472_v48 = vmax.f32 %v323_v39, 0.0  ;;  %v533_v56 = vpack.c.bf16 %v471_v43, %v469_v49  ;;  %v327_v61 = vadd.f32 %v326_v44, %v3198_v13  ;;  %v363_v44 = vadd.f32 %v3208_v25, %v3194_v12  ;;  %v3386_v49 = vpop.f32.mrf.mxu1 }
 0x11a   :  { %v328_v50 = vpop.f32.mrf.mxu0 }
 0x11b   :  { %v534_v51 = vpack.c.bf16 %v472_v48, %v470_v47  ;;  %1925 = vmatpush2.bf16.msra.mxu1 %v2597_v40  ;;  %2110 = vmatpush2.bf16.msra.mxu0 %v2598_v41  ;;  %v329_v59 = vadd.f32 %v328_v50, %v3194_v12  ;;  %v473_v16 = vmax.f32 %v327_v61, 0.0  ;;  %v359_v41 = vadd.f32 %v3200_v15, %v3194_v12 }
 0x11c   :  { %v330_v57 = vpop.f32.mrf.mxu0  ;;  %1926 = vmatprep.subr.bf16.mxu1 %v2958_v0  ;;  %2111 = vmatprep.subr.bf16.mxu0 %v2958_v0 }
 0x11d   :  { %v331_v60 = vadd.f32 %v330_v57, %v3198_v13  ;;  %1057 = vmatprep.mubr.bf16.mxu1 %v534_v51  ;;  %1280 = vmatprep.mubr.bf16.mxu0 %v534_v51  ;;  %v474_v10 = vmax.f32 %v329_v59, 0.0  ;;  %v486_v15 = vmax.f32 %v359_v41, 0.0  ;;  %v488_v57 = vmax.f32 %v363_v44, 0.0  ;;  %v3392_v59 = vpop.f32.mrf.mxu1 }
 0x11e   :  { %v332_v62 = vpop.f32.mrf.mxu0  ;;  %1058 = vmatmul.mubr.bf16.gmra.mxu1 %v533_v56  ;;  %1281 = vmatmul.mubr.bf16.gmra.mxu0 %v533_v56  ;;  %v393_v41 = vadd.f32 %v3348_v46, %v3194_v12  ;;  %v377_v44 = vadd.f32 %v3262_v20, %v3198_v13  ;;  %v2606_v46 = vld [vmem:[%s3695_s5 + $0xc0] sm:$0xff]  }
 0x11f   :  { %v333_v63 = vadd.f32 %v332_v62, %v3194_v12  ;;  %1927 = vmatpush2.bf16.msra.mxu1 %v2599_v52  ;;  %2112 = vmatpush2.bf16.msra.mxu0 %v2600_v54  ;;  %v475_v4 = vmax.f32 %v331_v60, 0.0 }
 0x120   :  { %v336_v5 = vpop.f32.mrf.mxu0  ;;  %1928 = vmatprep.subr.bf16.mxu1 %v2958_v0  ;;  %2113 = vmatprep.subr.bf16.mxu0 %v2958_v0  ;;  %v493_v20 = vmax.f32 %v377_v44, 0.0 }
 0x121   :  { %v476_v14 = vmax.f32 %v333_v63, 0.0  ;;  %v535_v22 = vpack.c.bf16 %v475_v4, %v473_v16  ;;  %v337_v28 = vadd.f32 %v336_v5, %v3198_v13  ;;  %v2602_v63 = vld [vmem:[%s3695_s5 + $0xd0] sm:$0xff]   ;;  %v542_v5 = vpack.c.bf16 %v488_v57, %v486_v15 }
 0x122   :  { %v338_v18 = vpop.f32.mrf.mxu0  ;;  %v403_v15 = vadd.f32 %v3380_v36, %v3194_v12  ;;  %v387_v57 = vadd.f32 %v3310_v1, %v3198_v13  ;;  %v409_v36 = vadd.f32 %v3392_v59, %v3194_v12 }
 0x123   :  { %v536_v19 = vpack.c.bf16 %v476_v14, %v474_v10  ;;  %1929 = vmatpush2.bf16.msra.mxu1 %v2601_v3  ;;  %v339_v26 = vadd.f32 %v338_v18, %v3194_v12  ;;  %v477_v39 = vmax.f32 %v337_v28, 0.0  ;;  %v369_v3 = vadd.f32 %v3228_v45, %v3194_v12  ;;  %2114 = vmatpush2.bf16.msra.mxu0 %v2602_v63 }
 0x124   :  { %v340_v23 = vpop.f32.mrf.mxu0  ;;  %1930 = vmatprep.subr.bf16.mxu1 %v2958_v0  ;;  %v373_v10 = vadd.f32 %v3252_v2, %v3194_v12  ;;  %v357_v14 = vadd.f32 %v3190_v11, %v3198_v13  ;;  %v361_v18 = vadd.f32 %v3202_v17, %v3198_v13  ;;  %2115 = vmatprep.subr.bf16.mxu0 %v2958_v0  ;;  %v497_v63 = vmax.f32 %v387_v57, 0.0 }
 0x125   :  { %v341_v27 = vadd.f32 %v340_v23, %v3198_v13  ;;  %1067 = vmatprep.mubr.bf16.mxu1 %v536_v19  ;;  %1290 = vmatprep.mubr.bf16.mxu0 %v536_v19  ;;  %v478_v37 = vmax.f32 %v339_v26, 0.0  ;;  %v3405_v19 = vpop.f32.mrf.mxu1  ;;  %v490_v45 = vmax.f32 %v369_v3, 0.0  ;;  %v379_v11 = vadd.f32 %v3276_v31, %v3194_v12 }
 0x126   :  { %v342_v29 = vpop.f32.mrf.mxu0  ;;  %1068 = vmatmul.mubr.bf16.gmra.mxu1 %v535_v22  ;;  %1291 = vmatmul.mubr.bf16.gmra.mxu0 %v535_v22  ;;  %v492_v22 = vmax.f32 %v373_v10, 0.0  ;;  %v485_v23 = vmax.f32 %v357_v14, 0.0  ;;  %v487_v2 = vmax.f32 %v361_v18, 0.0  ;;  %v401_v10 = vadd.f32 %v3373_v24, %v3198_v13 }
 0x127   :  { %v343_v30 = vadd.f32 %v342_v29, %v3194_v12  ;;  %v479_v32 = vmax.f32 %v341_v27, 0.0  ;;  %v412_v26 = vpop.f32.mrf.mxu1  ;;  %v383_v27 = vadd.f32 %v3300_v53, %v3194_v12  ;;  %v367_v29 = vadd.f32 %v3216_v35, %v3198_v13  ;;  %v2603_v53 = vld [vmem:[%s3695_s5 + $0x48] sm:$0xff]  }
 0x128   :  { %v346_v34 = vpop.f32.mrf.mxu0  ;;  %v544_v17 = vpack.c.bf16 %v492_v22, %v490_v45  ;;  %v541_v28 = vpack.c.bf16 %v487_v2, %v485_v23  ;;  %v2604_v35 = vld [vmem:[%s3695_s5 + $0xc8] sm:$0xff]   ;;  %1931 = vmatpush2.bf16.msra.mxu1 %v2603_v53  ;;  %v503_v22 = vmax.f32 %v401_v10, 0.0  ;;  %v411_v24 = vadd.f32 %v3405_v19, %v3198_v13 }
 0x129   :  { %v480_v38 = vmax.f32 %v343_v30, 0.0  ;;  %v537_v47 = vpack.c.bf16 %v479_v32, %v477_v39  ;;  %v347_v52 = vadd.f32 %v346_v34, %v3198_v13  ;;  %v371_v30 = vadd.f32 %v3238_v55, %v3198_v13  ;;  %v3416_v32 = vpop.f32.mrf.mxu1  ;;  %2116 = vmatpush2.bf16.msra.mxu0 %v2604_v35  ;;  %1932 = vmatprep.subr.bf16.mxu1 %v2958_v0 }
 0x12a   :  { %v348_v40 = vpop.f32.mrf.mxu0  ;;  %v494_v34 = vmax.f32 %v379_v11, 0.0  ;;  %v489_v31 = vmax.f32 %v367_v29, 0.0  ;;  %v389_v55 = vadd.f32 %v3324_v21, %v3194_v12  ;;  %2117 = vmatprep.subr.bf16.mxu0 %v2958_v0  ;;  %v2605_v21 = vld [vmem:[%s3695_s5 + $0x40] sm:$0xff]  }
 0x12b   :  { %v538_v43 = vpack.c.bf16 %v480_v38, %v478_v37  ;;  %v349_v50 = vadd.f32 %v348_v40, %v3194_v12  ;;  %v481_v62 = vmax.f32 %v347_v52, 0.0  ;;  %v496_v37 = vmax.f32 %v383_v27, 0.0  ;;  %v418_v39 = vpop.f32.mrf.mxu1 }
 0x12c   :  { %v350_v48 = vpop.f32.mrf.mxu0  ;;  %v491_v38 = vmax.f32 %v371_v30, 0.0  ;;  %v498_v0 = vmax.f32 %v389_v55, 0.0  ;;  %1933 = vmatpush2.bf16.msra.mxu1 %v2605_v21  ;;  %v419_v23 = vadd.f32 %v418_v39, %v3194_v12  ;;  %v507_v30 = vmax.f32 %v411_v24, 0.0 }
 0x12d   :  { %v351_v51 = vadd.f32 %v350_v48, %v3198_v13  ;;  %1077 = vmatprep.mubr.bf16.mxu1 %v538_v43  ;;  %1300 = vmatprep.mubr.bf16.mxu0 %v538_v43  ;;  %v482_v60 = vmax.f32 %v349_v50, 0.0  ;;  %v546_v40 = vpack.c.bf16 %v496_v37, %v494_v34  ;;  %v3434_v48 = vpop.f32.mrf.mxu1  ;;  %v500_v50 = vmax.f32 %v393_v41, 0.0 }
 0x12e   :  { %v352_v54 = vpop.f32.mrf.mxu0  ;;  %1078 = vmatmul.mubr.bf16.gmra.mxu1 %v537_v47  ;;  %1301 = vmatmul.mubr.bf16.gmra.mxu0 %v537_v47  ;;  %v543_v43 = vpack.c.bf16 %v491_v38, %v489_v31  ;;  %v381_v47 = vadd.f32 %v3286_v42, %v3198_v13  ;;  %v399_v42 = vadd.f32 %v3369_v9, %v3194_v12  ;;  %v510_v27 = vmax.f32 %v419_v23, 0.0 }
 0x12f   :  { %v353_v56 = vadd.f32 %v352_v54, %v3194_v12  ;;  %v483_v25 = vmax.f32 %v351_v51, 0.0  ;;  %v422_v52 = vpop.f32.mrf.mxu1  ;;  %2118 = vmatpush2.bf16.msra.mxu0 %v2606_v46  ;;  %v548_v54 = vpack.c.bf16 %v500_v50, %v498_v0  ;;  %v421_v19 = vadd.f32 %v3434_v48, %v3198_v13 }
 0x130   :  { %v495_v51 = vmax.f32 %v381_v47, 0.0 }
 0x131   :  { %v484_v61 = vmax.f32 %v353_v56, 0.0  ;;  %v539_v16 = vpack.c.bf16 %v483_v25, %v481_v62  ;;  %v391_v25 = vadd.f32 %v3334_v33, %v3198_v13  ;;  %v504_v62 = vmax.f32 %v403_v15, 0.0 }
 0x132   :  { %v545_v56 = vpack.c.bf16 %v495_v51, %v493_v20  ;;  %v397_v33 = vadd.f32 %v3358_v58, %v3198_v13  ;;  %v407_v58 = vadd.f32 %v3386_v49, %v3198_v13  ;;  %v417_v49 = vadd.f32 %v3416_v32, %v3198_v13 }
 0x133   :  { %v540_v4 = vpack.c.bf16 %v484_v61, %v482_v60  ;;  %v426_v60 = vpop.f32.mrf.mxu1  ;;  %v502_v61 = vmax.f32 %v399_v42, 0.0  ;;  %v499_v9 = vmax.f32 %v391_v25, 0.0  ;;  %v511_v41 = vmax.f32 %v421_v19, 0.0  ;;  %v623_v25 = vld [vmem:[%s3694_s4] sm:$0xf] }
 0x134   :  { %v501_v45 = vmax.f32 %v397_v33, 0.0  ;;  %v505_v29 = vmax.f32 %v407_v58, 0.0  ;;  %v427_v32 = vadd.f32 %v426_v60, %v3198_v13  ;;  %v639_v60 = vsub.s32 3, %v3183_v6 }
 0x135   :  { %1087 = vmatprep.mubr.bf16.mxu1 %v540_v4  ;;  %1310 = vmatprep.mubr.bf16.mxu0 %v540_v4  ;;  %v428_v3 = vpop.f32.mrf.mxu1  ;;  %v550_v4 = vpack.c.bf16 %v504_v62, %v502_v61  ;;  %v547_v1 = vpack.c.bf16 %v499_v9, %v497_v63  ;;  %v3481_v61 = vrot.slane %v623_v25, %v111_v8 }
 0x136   :  { %1088 = vmatmul.mubr.bf16.gmra.mxu1 %v539_v16  ;;  %1311 = vmatmul.mubr.bf16.gmra.mxu0 %v539_v16  ;;  %v506_v16 = vmax.f32 %v409_v36, 0.0  ;;  %v549_v11 = vpack.c.bf16 %v503_v22, %v501_v45  ;;  %v429_v37 = vadd.f32 %v428_v3, %v3194_v12  ;;  %v551_v39 = vpack.c.bf16 %v507_v30, %v505_v29 }
 0x137   :  { %1097 = vmatprep.mubr.bf16.mxu1 %v542_v5  ;;  %1320 = vmatprep.mubr.bf16.mxu0 %v542_v5  ;;  %v413_v5 = vadd.f32 %v412_v26, %v3194_v12  ;;  %v430_v14 = vpop.f32.mrf.mxu1  ;;  %v423_v26 = vadd.f32 %v422_v52, %v3194_v12  ;;  %v513_v20 = vmax.f32 %v427_v32, 0.0  ;;  %v3486_v62 = vrot.slane %v623_v25, %v115_v7 }
 0x138   :  { %v514_v35 = vmax.f32 %v429_v37, 0.0  ;;  %v431_v48 = vadd.f32 %v430_v14, %v3198_v13  ;;  %v3488_v63 = vrot.slane %v623_v25, %v639_v60 }
 0x139   :  { %v508_v18 = vmax.f32 %v413_v5, 0.0  ;;  %v432_v59 = vpop.f32.mrf.mxu1 }
 0x13a   :  { %v433_v38 = vadd.f32 %v432_v59, %v3194_v12  ;;  %v515_v51 = vmax.f32 %v431_v48, 0.0 }
 0x13b   :  { %v552_v2 = vpack.c.bf16 %v508_v18, %v506_v16 }
 0x13c   :  { %v516_v55 = vmax.f32 %v433_v38, 0.0  ;;  %v555_v42 = vpack.c.bf16 %v515_v51, %v513_v20 }
 0x13e   :  { %1098 = vmatmul.mubr.bf16.gmra.mxu1 %v541_v28  ;;  %1321 = vmatmul.mubr.bf16.gmra.mxu0 %v541_v28  ;;  %v512_v28 = vmax.f32 %v423_v26, 0.0  ;;  %v556_v47 = vpack.c.bf16 %v516_v55, %v514_v35 }
 0x13f   :  { %1107 = vmatprep.mubr.bf16.mxu1 %v544_v17  ;;  %1330 = vmatprep.mubr.bf16.mxu0 %v544_v17  ;;  %v436_v17 = vpop.f32.mrf.mxu1 }
 0x140   :  { %v554_v31 = vpack.c.bf16 %v512_v28, %v510_v27 }
 0x141   :  { %v438_v34 = vpop.f32.mrf.mxu1 }
 0x142   :  { %v439_v44 = vadd.f32 %v438_v34, %v3194_v12 }
 0x143   :  { %v440_v53 = vpop.f32.mrf.mxu1 }
 0x144   :  { %v518_v0 = vmax.f32 %v439_v44, 0.0  ;;  %v441_v15 = vadd.f32 %v440_v53, %v3198_v13 }
 0x146   :  { %1108 = vmatmul.mubr.bf16.gmra.mxu1 %v543_v43  ;;  %1331 = vmatmul.mubr.bf16.gmra.mxu0 %v543_v43  ;;  %v442_v43 = vpop.f32.mrf.mxu1 }
 0x147   :  { %1117 = vmatprep.mubr.bf16.mxu1 %v546_v40  ;;  %1340 = vmatprep.mubr.bf16.mxu0 %v546_v40  ;;  %v509_v40 = vmax.f32 %v417_v49, 0.0  ;;  %v443_v21 = vadd.f32 %v442_v43, %v3194_v12 }
 0x149   :  { %v553_v46 = vpack.c.bf16 %v511_v41, %v509_v40  ;;  %v520_v50 = vmax.f32 %v443_v21, 0.0 }
 0x14b   :  { %v558_v52 = vpack.c.bf16 %v520_v50, %v518_v0 }
 0x14e   :  { %1118 = vmatmul.mubr.bf16.gmra.mxu1 %v545_v56  ;;  %1341 = vmatmul.mubr.bf16.gmra.mxu0 %v545_v56  ;;  %v519_v56 = vmax.f32 %v441_v15, 0.0 }
 0x14f   :  { %1127 = vmatprep.mubr.bf16.mxu1 %v548_v54  ;;  %1350 = vmatprep.mubr.bf16.mxu0 %v548_v54  ;;  %v437_v54 = vadd.f32 %v436_v17, %v3198_v13  ;;  %v635_v13 = vsub.s32 2, %v3183_v6 }
 0x151   :  { %v517_v12 = vmax.f32 %v437_v54, 0.0 }
 0x153   :  { %v557_v57 = vpack.c.bf16 %v519_v56, %v517_v12 }
 0x156   :  { %1128 = vmatmul.mubr.bf16.gmra.mxu1 %v547_v1  ;;  %1351 = vmatmul.mubr.bf16.gmra.mxu0 %v547_v1  ;;  %v3491_v1 = vrot.slane %v623_v25, %v635_v13 }
 0x157   :  { %1137 = vmatprep.mubr.bf16.mxu1 %v550_v4  ;;  %1360 = vmatprep.mubr.bf16.mxu0 %v550_v4 }
 0x15e   :  { %1138 = vmatmul.mubr.bf16.gmra.mxu1 %v549_v11  ;;  %1361 = vmatmul.mubr.bf16.gmra.mxu0 %v549_v11 }
 0x15f   :  { %1147 = vmatprep.mubr.bf16.mxu1 %v552_v2  ;;  %1370 = vmatprep.mubr.bf16.mxu0 %v552_v2 }
 0x166   :  { %1148 = vmatmul.mubr.bf16.gmra.mxu1 %v551_v39  ;;  %1371 = vmatmul.mubr.bf16.gmra.mxu0 %v551_v39 }
 0x167   :  { %1157 = vmatprep.mubr.bf16.mxu1 %v554_v31  ;;  %1380 = vmatprep.mubr.bf16.mxu0 %v554_v31 }
 0x16e   :  { %1158 = vmatmul.mubr.bf16.gmra.mxu1 %v553_v46  ;;  %1381 = vmatmul.mubr.bf16.gmra.mxu0 %v553_v46 }
 0x16f   :  { %1167 = vmatprep.mubr.bf16.mxu1 %v556_v47  ;;  %1390 = vmatprep.mubr.bf16.mxu0 %v556_v47 }
 0x176   :  { %1168 = vmatmul.mubr.bf16.gmra.mxu1 %v555_v42  ;;  %1391 = vmatmul.mubr.bf16.gmra.mxu0 %v555_v42 }
 0x177   :  { %1177 = vmatprep.mubr.bf16.mxu1 %v558_v52  ;;  %1400 = vmatprep.mubr.bf16.mxu0 %v558_v52 }
 0x17e   :  { %1178 = vmatmul.mubr.bf16.gmra.mxu1 %v557_v57  ;;  %1401 = vmatmul.mubr.bf16.gmra.mxu0 %v557_v57 }
 0x1ae   :  { %v999_v9 = vpop.f32.mrf.mxu1  ;;  %v1222_v3 = vpop.f32.mrf.mxu0 }
 0x1af   :  { %v1000_v36 = vadd.f32 %v999_v9, %v3481_v61  ;;  %v1223_v45 = vadd.f32 %v1222_v3, %v3491_v1 }
 0x1b0   :  { %v1001_v4 = vpop.f32.mrf.mxu1  ;;  %v1224_v5 = vpop.f32.mrf.mxu0 }
 0x1b1   :  { %v1002_v33 = vadd.f32 %v1001_v4, %v3486_v62  ;;  %v1225_v8 = vadd.f32 %v1224_v5, %v3488_v63  ;;  %2607 = vtanh.f32 %v1000_v36 }
 0x1b2   :  { %v1003_v10 = vpop.f32.mrf.mxu1  ;;  %v1226_v14 = vpop.f32.mrf.mxu0 }
 0x1b3   :  { %2609 = vtanh.f32 %v1002_v33  ;;  %v1004_v6 = vadd.f32 %v1003_v10, %v3481_v61  ;;  %v1227_v7 = vadd.f32 %v1226_v14, %v3491_v1 }
 0x1b4   :  { %2611 = vtanh.f32 %v1225_v8  ;;  %v1005_v16 = vpop.f32.mrf.mxu1  ;;  %v1228_v18 = vpop.f32.mrf.mxu0 }
 0x1b5   :  { %2613 = vtanh.f32 %v1004_v6  ;;  %v1006_v22 = vadd.f32 %v1005_v16, %v3486_v62  ;;  %v1229_v59 = vadd.f32 %v1228_v18, %v3488_v63 }
 0x1b6   :  { %2615 = vtanh.f32 %v1227_v7  ;;  %v1009_v23 = vpop.f32.mrf.mxu1  ;;  %v1232_v2 = vpop.f32.mrf.mxu0 }
 0x1b7   :  { %2617 = vtanh.f32 %v1006_v22  ;;  %v1010_v26 = vadd.f32 %v1009_v23, %v3481_v61  ;;  %v1233_v31 = vadd.f32 %v1232_v2, %v3491_v1 }
 0x1b8   :  { %2619 = vtanh.f32 %v1229_v59  ;;  %v1011_v11 = vpop.f32.mrf.mxu1  ;;  %v1234_v58 = vpop.f32.mrf.mxu0 }
 0x1b9   :  { %2621 = vtanh.f32 %v1223_v45  ;;  %v1012_v24 = vadd.f32 %v1011_v11, %v3486_v62  ;;  %v1235_v17 = vadd.f32 %v1234_v58, %v3488_v63 }
 0x1ba   :  { %2623 = vtanh.f32 %v1010_v26  ;;  %v1013_v27 = vpop.f32.mrf.mxu1  ;;  %v1236_v28 = vpop.f32.mrf.mxu0 }
 0x1bb   :  { %2625 = vtanh.f32 %v1012_v24  ;;  %v1014_v29 = vadd.f32 %v1013_v27, %v3481_v61  ;;  %v1237_v30 = vadd.f32 %v1236_v28, %v3491_v1 }
 0x1bc   :  { %2627 = vtanh.f32 %v1235_v17  ;;  %v1015_v34 = vpop.f32.mrf.mxu1  ;;  %v1238_v37 = vpop.f32.mrf.mxu0 }
 0x1bd   :  { %2629 = vtanh.f32 %v1014_v29  ;;  %v1016_v38 = vadd.f32 %v1015_v34, %v3486_v62  ;;  %v1239_v39 = vadd.f32 %v1238_v37, %v3488_v63 }
 0x1be   :  { %2631 = vtanh.f32 %v1237_v30  ;;  %v1019_v49 = vpop.f32.mrf.mxu1  ;;  %v1242_v19 = vpop.f32.mrf.mxu0 }
 0x1bf   :  { %v2608_v53 = vpop.eup %2607  ;;  %2633 = vtanh.f32 %v1016_v38  ;;  %v1020_v35 = vadd.f32 %v1019_v49, %v3481_v61  ;;  %v1243_v51 = vadd.f32 %v1242_v19, %v3491_v1 }
 0x1c0   :  { %v2610_v55 = vpop.eup %2609  ;;  %2635 = vtanh.f32 %v1239_v39  ;;  %v1021_v40 = vpop.f32.mrf.mxu1 }
 0x1c1   :  { %v1244_v41 = vpop.f32.mrf.mxu0  ;;  %v2612_v43 = vpop.eup %2611  ;;  %2637 = vtanh.f32 %v1233_v31  ;;  %v1022_v44 = vadd.f32 %v1021_v40, %v3486_v62 }
 0x1c2   :  { %v1245_v47 = vadd.f32 %v1244_v41, %v3488_v63  ;;  %v2614_v21 = vpop.eup %2613  ;;  %2639 = vtanh.f32 %v1020_v35  ;;  %v1023_v46 = vpop.f32.mrf.mxu1 }
 0x1c3   :  { %v1246_v32 = vpop.f32.mrf.mxu0  ;;  %v2616_v48 = vpop.eup %2615  ;;  %2641 = vtanh.f32 %v1022_v44  ;;  %v1024_v0 = vadd.f32 %v1023_v46, %v3481_v61  ;;  %v1563_v25 = vpack.c.bf16 %v2614_v21, %v2608_v53 }
 0x1c4   :  { %v1247_v50 = vadd.f32 %v1246_v32, %v3491_v1  ;;  %v2618_v20 = vpop.eup %2617  ;;  %2643 = vtanh.f32 %v1245_v47  ;;  %v1025_v52 = vpop.f32.mrf.mxu1 }
 0x1c5   :  { %v1248_v42 = vpop.f32.mrf.mxu0  ;;  %v2620_v54 = vpop.eup %2619  ;;  %2645 = vtanh.f32 %v1024_v0  ;;  %v1026_v15 = vadd.f32 %v1025_v52, %v3486_v62  ;;  %v1564_v56 = vpack.c.bf16 %v2618_v20, %v2610_v55 }
 0x1c6   :  { %v1249_v12 = vadd.f32 %v1248_v42, %v3488_v63  ;;  %v2622_v57 = vpop.eup %2621  ;;  %2647 = vtanh.f32 %v1247_v50  ;;  %v1029_v60 = vpop.f32.mrf.mxu1  ;;  %v1566_v9 = vpack.c.bf16 %v2620_v54, %v2612_v43 }
 0x1c7   :  { %v1252_v13 = vpop.f32.mrf.mxu0  ;;  %v2624_v3 = vpop.eup %2623  ;;  %v1565_v36 = vpack.c.bf16 %v2616_v48, %v2622_v57  ;;  %2649 = vtanh.f32 %v1026_v15  ;;  %v1030_v4 = vadd.f32 %v1029_v60, %v3481_v61  ;;  %1934 = vmatprep.mubr.bf16.mxu1 %v1564_v56 }
 0x1c8   :  { %v2626_v5 = vpop.eup %2625  ;;  %2651 = vtanh.f32 %v1249_v12  ;;  %2119 = vmatprep.mubr.bf16.mxu0 %v1566_v9  ;;  %v1031_v33 = vpop.f32.mrf.mxu1  ;;  %1935 = vmatmul.mubr.bf16.vlgmr.msra.gmra.mxu1 %v1563_v25  ;;  %v1253_v2 = vadd.f32 %v1252_v13, %v3491_v1 }
 0x1c9   :  { %v1254_v8 = vpop.f32.mrf.mxu0  ;;  %v2628_v10 = vpop.eup %2627  ;;  %2653 = vtanh.f32 %v1243_v51  ;;  %v1032_v14 = vadd.f32 %v1031_v33, %v3486_v62  ;;  %2120 = vmatmul.mubr.bf16.vlgmr.msra.gmra.mxu0 %v1565_v36 }
 0x1ca   :  { %v1255_v6 = vadd.f32 %v1254_v8, %v3488_v63  ;;  %v2630_v7 = vpop.eup %2629  ;;  %2655 = vtanh.f32 %v1030_v4  ;;  %v1033_v16 = vpop.f32.mrf.mxu1 }
 0x1cb   :  { %v1256_v18 = vpop.f32.mrf.mxu0  ;;  %v2632_v45 = vpop.eup %2631  ;;  %2657 = vtanh.f32 %v1032_v14  ;;  %v1034_v22 = vadd.f32 %v1033_v16, %v3481_v61  ;;  %v1567_v37 = vpack.c.bf16 %v2630_v7, %v2624_v3 }
 0x1cc   :  { %v1257_v59 = vadd.f32 %v1256_v18, %v3491_v1  ;;  %v2634_v23 = vpop.eup %2633  ;;  %2659 = vtanh.f32 %v1255_v6  ;;  %v1035_v26 = vpop.f32.mrf.mxu1 }
 0x1cd   :  { %v1258_v11 = vpop.f32.mrf.mxu0  ;;  %v2636_v58 = vpop.eup %2635  ;;  %2661 = vtanh.f32 %v1034_v22  ;;  %v1036_v24 = vadd.f32 %v1035_v26, %v3486_v62  ;;  %v1568_v27 = vpack.c.bf16 %v2634_v23, %v2626_v5 }
 0x1ce   :  { %v1259_v17 = vadd.f32 %v1258_v11, %v3488_v63  ;;  %v2638_v28 = vpop.eup %2637  ;;  %2663 = vtanh.f32 %v1257_v59  ;;  %v1039_v29 = vpop.f32.mrf.mxu1  ;;  %v1570_v34 = vpack.c.bf16 %v2636_v58, %v2628_v10 }
 0x1cf   :  { %v1262_v30 = vpop.f32.mrf.mxu0  ;;  %v2640_v31 = vpop.eup %2639  ;;  %2665 = vtanh.f32 %v1036_v24  ;;  %v1040_v38 = vadd.f32 %v1039_v29, %v3481_v61  ;;  %1942 = vmatprep.mubr.bf16.mxu1 %v1568_v27  ;;  %v1569_v39 = vpack.c.bf16 %v2632_v45, %v2638_v28 }
 0x1d0   :  { %v2642_v49 = vpop.eup %2641  ;;  %2667 = vtanh.f32 %v1259_v17  ;;  %2127 = vmatprep.mubr.bf16.mxu0 %v1570_v34  ;;  %v1041_v19 = vpop.f32.mrf.mxu1  ;;  %1943 = vmatmul.mubr.bf16.gmra.mxu1 %v1567_v37  ;;  %v1263_v48 = vadd.f32 %v1262_v30, %v3491_v1 }
 0x1d1   :  { %v1264_v53 = vpop.f32.mrf.mxu0  ;;  %v2644_v35 = vpop.eup %2643  ;;  %2669 = vtanh.f32 %v1253_v2  ;;  %v1042_v55 = vadd.f32 %v1041_v19, %v3486_v62  ;;  %2128 = vmatmul.mubr.bf16.gmra.mxu0 %v1569_v39 }
 0x1d2   :  { %v1265_v40 = vadd.f32 %v1264_v53, %v3488_v63  ;;  %v2646_v41 = vpop.eup %2645  ;;  %2671 = vtanh.f32 %v1040_v38  ;;  %v1043_v43 = vpop.f32.mrf.mxu1 }
 0x1d3   :  { %v1266_v44 = vpop.f32.mrf.mxu0  ;;  %v2648_v47 = vpop.eup %2647  ;;  %2673 = vtanh.f32 %v1042_v55  ;;  %v1044_v21 = vadd.f32 %v1043_v43, %v3481_v61  ;;  %v1571_v57 = vpack.c.bf16 %v2646_v41, %v2640_v31 }
 0x1d4   :  { %v1267_v46 = vadd.f32 %v1266_v44, %v3491_v1  ;;  %v2650_v32 = vpop.eup %2649  ;;  %2675 = vtanh.f32 %v1265_v40  ;;  %v1045_v0 = vpop.f32.mrf.mxu1 }
 0x1d5   :  { %v1268_v50 = vpop.f32.mrf.mxu0  ;;  %v2652_v20 = vpop.eup %2651  ;;  %2677 = vtanh.f32 %v1044_v21  ;;  %v1046_v51 = vadd.f32 %v1045_v0, %v3486_v62  ;;  %v1572_v42 = vpack.c.bf16 %v2650_v32, %v2642_v49 }
 0x1d6   :  { %v1269_v52 = vadd.f32 %v1268_v50, %v3488_v63  ;;  %v2654_v54 = vpop.eup %2653  ;;  %2679 = vtanh.f32 %v1267_v46  ;;  %v1049_v15 = vpop.f32.mrf.mxu1  ;;  %v1574_v56 = vpack.c.bf16 %v2652_v20, %v2644_v35 }
 0x1d7   :  { %v1272_v12 = vpop.f32.mrf.mxu0  ;;  %v2656_v25 = vpop.eup %2655  ;;  %2681 = vtanh.f32 %v1046_v51  ;;  %v1050_v60 = vadd.f32 %v1049_v15, %v3481_v61  ;;  %1950 = vmatprep.mubr.bf16.mxu1 %v1572_v42  ;;  %v1573_v13 = vpack.c.bf16 %v2648_v47, %v2654_v54 }
 0x1d8   :  { %v2658_v9 = vpop.eup %2657  ;;  %2683 = vtanh.f32 %v1269_v52  ;;  %2135 = vmatprep.mubr.bf16.mxu0 %v1574_v56  ;;  %v1051_v3 = vpop.f32.mrf.mxu1  ;;  %1951 = vmatmul.mubr.bf16.gmra.mxu1 %v1571_v57  ;;  %v1273_v45 = vadd.f32 %v1272_v12, %v3491_v1 }
 0x1d9   :  { %v1274_v36 = vpop.f32.mrf.mxu0  ;;  %v2660_v4 = vpop.eup %2659  ;;  %2685 = vtanh.f32 %v1263_v48  ;;  %v1052_v5 = vadd.f32 %v1051_v3, %v3486_v62  ;;  %2136 = vmatmul.mubr.bf16.gmra.mxu0 %v1573_v13 }
 0x1da   :  { %v1275_v33 = vadd.f32 %v1274_v36, %v3488_v63  ;;  %v2662_v8 = vpop.eup %2661  ;;  %2687 = vtanh.f32 %v1050_v60  ;;  %v1053_v10 = vpop.f32.mrf.mxu1 }
 0x1db   :  { %v1276_v14 = vpop.f32.mrf.mxu0  ;;  %v2664_v6 = vpop.eup %2663  ;;  %2689 = vtanh.f32 %v1052_v5  ;;  %v1054_v7 = vadd.f32 %v1053_v10, %v3481_v61  ;;  %v1575_v28 = vpack.c.bf16 %v2662_v8, %v2656_v25 }
 0x1dc   :  { %v1277_v16 = vadd.f32 %v1276_v14, %v3491_v1  ;;  %v2666_v18 = vpop.eup %2665  ;;  %2691 = vtanh.f32 %v1275_v33  ;;  %v1055_v22 = vpop.f32.mrf.mxu1 }
 0x1dd   :  { %v1278_v59 = vpop.f32.mrf.mxu0  ;;  %v2668_v23 = vpop.eup %2667  ;;  %2693 = vtanh.f32 %v1054_v7  ;;  %v1056_v2 = vadd.f32 %v1055_v22, %v3486_v62  ;;  %v1576_v11 = vpack.c.bf16 %v2666_v18, %v2658_v9 }
 0x1de   :  { %v1279_v26 = vadd.f32 %v1278_v59, %v3488_v63  ;;  %v2670_v58 = vpop.eup %2669  ;;  %2695 = vtanh.f32 %v1277_v16  ;;  %v1059_v24 = vpop.f32.mrf.mxu1  ;;  %v1578_v27 = vpack.c.bf16 %v2668_v23, %v2660_v4 }
 0x1df   :  { %v1282_v17 = vpop.f32.mrf.mxu0  ;;  %v2672_v29 = vpop.eup %2671  ;;  %2697 = vtanh.f32 %v1056_v2  ;;  %v1060_v30 = vadd.f32 %v1059_v24, %v3481_v61  ;;  %1958 = vmatprep.mubr.bf16.mxu1 %v1576_v11  ;;  %v1577_v34 = vpack.c.bf16 %v2664_v6, %v2670_v58 }
 0x1e0   :  { %v2674_v37 = vpop.eup %2673  ;;  %2699 = vtanh.f32 %v1279_v26  ;;  %2143 = vmatprep.mubr.bf16.mxu0 %v1578_v27  ;;  %v1061_v31 = vpop.f32.mrf.mxu1  ;;  %1959 = vmatmul.mubr.bf16.gmra.mxu1 %v1575_v28  ;;  %v1283_v47 = vadd.f32 %v1282_v17, %v3491_v1 }
 0x1e1   :  { %v1284_v38 = vpop.f32.mrf.mxu0  ;;  %v2676_v39 = vpop.eup %2675  ;;  %2701 = vtanh.f32 %v1273_v45  ;;  %v1062_v49 = vadd.f32 %v1061_v31, %v3486_v62  ;;  %2144 = vmatmul.mubr.bf16.gmra.mxu0 %v1577_v34 }
 0x1e2   :  { %v1285_v19 = vadd.f32 %v1284_v38, %v3488_v63  ;;  %v2678_v53 = vpop.eup %2677  ;;  %2703 = vtanh.f32 %v1060_v30  ;;  %v1063_v35 = vpop.f32.mrf.mxu1 }
 0x1e3   :  { %v1286_v55 = vpop.f32.mrf.mxu0  ;;  %v2680_v40 = vpop.eup %2679  ;;  %2705 = vtanh.f32 %v1062_v49  ;;  %v1064_v41 = vadd.f32 %v1063_v35, %v3481_v61  ;;  %v1579_v54 = vpack.c.bf16 %v2678_v53, %v2672_v29 }
 0x1e4   :  { %v1287_v43 = vadd.f32 %v1286_v55, %v3491_v1  ;;  %v2682_v44 = vpop.eup %2681  ;;  %2707 = vtanh.f32 %v1285_v19  ;;  %v1065_v21 = vpop.f32.mrf.mxu1 }
 0x1e5   :  { %v1288_v46 = vpop.f32.mrf.mxu0  ;;  %v2684_v32 = vpop.eup %2683  ;;  %2709 = vtanh.f32 %v1064_v41  ;;  %v1066_v48 = vadd.f32 %v1065_v21, %v3486_v62  ;;  %v1580_v50 = vpack.c.bf16 %v2682_v44, %v2674_v37 }
 0x1e6   :  { %v1289_v0 = vadd.f32 %v1288_v46, %v3488_v63  ;;  %v2686_v20 = vpop.eup %2685  ;;  %2711 = vtanh.f32 %v1287_v43  ;;  %v1069_v51 = vpop.f32.mrf.mxu1  ;;  %v1582_v42 = vpack.c.bf16 %v2684_v32, %v2676_v39 }
 0x1e7   :  { %v1292_v52 = vpop.f32.mrf.mxu0  ;;  %v2688_v15 = vpop.eup %2687  ;;  %2713 = vtanh.f32 %v1066_v48  ;;  %v1070_v12 = vadd.f32 %v1069_v51, %v3481_v61  ;;  %1966 = vmatprep.mubr.bf16.mxu1 %v1580_v50  ;;  %v1581_v56 = vpack.c.bf16 %v2680_v40, %v2686_v20 }
 0x1e8   :  { %v2690_v57 = vpop.eup %2689  ;;  %2715 = vtanh.f32 %v1289_v0  ;;  %2151 = vmatprep.mubr.bf16.mxu0 %v1582_v42  ;;  %v1071_v25 = vpop.f32.mrf.mxu1  ;;  %1967 = vmatmul.mubr.bf16.gmra.mxu1 %v1579_v54  ;;  %v1293_v6 = vadd.f32 %v1292_v52, %v3491_v1 }
 0x1e9   :  { %v1294_v60 = vpop.f32.mrf.mxu0  ;;  %v2692_v13 = vpop.eup %2691  ;;  %2717 = vtanh.f32 %v1283_v47  ;;  %v1072_v9 = vadd.f32 %v1071_v25, %v3486_v62  ;;  %2152 = vmatmul.mubr.bf16.gmra.mxu0 %v1581_v56 }
 0x1ea   :  { %v1295_v3 = vadd.f32 %v1294_v60, %v3488_v63  ;;  %v2694_v36 = vpop.eup %2693  ;;  %2719 = vtanh.f32 %v1070_v12  ;;  %v1073_v4 = vpop.f32.mrf.mxu1 }
 0x1eb   :  { %v1296_v5 = vpop.f32.mrf.mxu0  ;;  %v2696_v33 = vpop.eup %2695  ;;  %2721 = vtanh.f32 %v1072_v9  ;;  %v1074_v8 = vadd.f32 %v1073_v4, %v3481_v61  ;;  %v1583_v58 = vpack.c.bf16 %v2694_v36, %v2688_v15 }
 0x1ec   :  { %v1297_v10 = vadd.f32 %v1296_v5, %v3491_v1  ;;  %v2698_v14 = vpop.eup %2697  ;;  %2723 = vtanh.f32 %v1295_v3  ;;  %v1075_v7 = vpop.f32.mrf.mxu1 }
 0x1ed   :  { %v1298_v16 = vpop.f32.mrf.mxu0  ;;  %v2700_v18 = vpop.eup %2699  ;;  %2725 = vtanh.f32 %v1074_v8  ;;  %v1076_v45 = vadd.f32 %v1075_v7, %v3486_v62  ;;  %v1584_v59 = vpack.c.bf16 %v2698_v14, %v2690_v57 }
 0x1ee   :  { %v1299_v22 = vadd.f32 %v1298_v16, %v3488_v63  ;;  %v2702_v23 = vpop.eup %2701  ;;  %2727 = vtanh.f32 %v1297_v10  ;;  %v1079_v2 = vpop.f32.mrf.mxu1  ;;  %v1586_v11 = vpack.c.bf16 %v2700_v18, %v2692_v13 }
 0x1ef   :  { %v1302_v26 = vpop.f32.mrf.mxu0  ;;  %v2704_v24 = vpop.eup %2703  ;;  %2729 = vtanh.f32 %v1076_v45  ;;  %v1080_v17 = vadd.f32 %v1079_v2, %v3481_v61  ;;  %1974 = vmatprep.mubr.bf16.mxu1 %v1584_v59  ;;  %v1585_v27 = vpack.c.bf16 %v2696_v33, %v2702_v23 }
 0x1f0   :  { %v2706_v28 = vpop.eup %2705  ;;  %2731 = vtanh.f32 %v1299_v22  ;;  %2159 = vmatprep.mubr.bf16.mxu0 %v1586_v11  ;;  %v1081_v29 = vpop.f32.mrf.mxu1  ;;  %1975 = vmatmul.mubr.bf16.gmra.mxu1 %v1583_v58  ;;  %v1303_v40 = vadd.f32 %v1302_v26, %v3491_v1 }
 0x1f1   :  { %v1304_v30 = vpop.f32.mrf.mxu0  ;;  %v2708_v34 = vpop.eup %2707  ;;  %2733 = vtanh.f32 %v1293_v6  ;;  %v1082_v37 = vadd.f32 %v1081_v29, %v3486_v62  ;;  %2160 = vmatmul.mubr.bf16.gmra.mxu0 %v1585_v27 }
 0x1f2   :  { %v1305_v31 = vadd.f32 %v1304_v30, %v3488_v63  ;;  %v2710_v38 = vpop.eup %2709  ;;  %2735 = vtanh.f32 %v1080_v17  ;;  %v1083_v39 = vpop.f32.mrf.mxu1 }
 0x1f3   :  { %v1306_v49 = vpop.f32.mrf.mxu0  ;;  %v2712_v19 = vpop.eup %2711  ;;  %2737 = vtanh.f32 %v1082_v37  ;;  %v1084_v53 = vadd.f32 %v1083_v39, %v3481_v61  ;;  %v1587_v20 = vpack.c.bf16 %v2710_v38, %v2704_v24 }
 0x1f4   :  { %v1307_v35 = vadd.f32 %v1306_v49, %v3491_v1  ;;  %v2714_v55 = vpop.eup %2713  ;;  %2739 = vtanh.f32 %v1305_v31  ;;  %v1085_v41 = vpop.f32.mrf.mxu1 }
 0x1f5   :  { %v1308_v43 = vpop.f32.mrf.mxu0  ;;  %v2716_v44 = vpop.eup %2715  ;;  %2741 = vtanh.f32 %v1084_v53  ;;  %v1086_v47 = vadd.f32 %v1085_v41, %v3486_v62  ;;  %v1588_v46 = vpack.c.bf16 %v2714_v55, %v2706_v28 }
 0x1f6   :  { %v1309_v21 = vadd.f32 %v1308_v43, %v3488_v63  ;;  %v2718_v32 = vpop.eup %2717  ;;  %2743 = vtanh.f32 %v1307_v35  ;;  %v1089_v48 = vpop.f32.mrf.mxu1  ;;  %v1590_v50 = vpack.c.bf16 %v2716_v44, %v2708_v34 }
 0x1f7   :  { %v1312_v0 = vpop.f32.mrf.mxu0  ;;  %v2720_v51 = vpop.eup %2719  ;;  %2745 = vtanh.f32 %v1086_v47  ;;  %v1090_v52 = vadd.f32 %v1089_v48, %v3481_v61  ;;  %1982 = vmatprep.mubr.bf16.mxu1 %v1588_v46  ;;  %v1589_v42 = vpack.c.bf16 %v2712_v19, %v2718_v32 }
 0x1f8   :  { %v2722_v54 = vpop.eup %2721  ;;  %2747 = vtanh.f32 %v1309_v21  ;;  %2167 = vmatprep.mubr.bf16.mxu0 %v1590_v50  ;;  %v1091_v15 = vpop.f32.mrf.mxu1  ;;  %1983 = vmatmul.mubr.bf16.gmra.mxu1 %v1587_v20  ;;  %v1313_v33 = vadd.f32 %v1312_v0, %v3491_v1 }
 0x1f9   :  { %v1314_v12 = vpop.f32.mrf.mxu0  ;;  %v2724_v56 = vpop.eup %2723  ;;  %2749 = vtanh.f32 %v1303_v40  ;;  %v1092_v57 = vadd.f32 %v1091_v15, %v3486_v62  ;;  %2168 = vmatmul.mubr.bf16.gmra.mxu0 %v1589_v42 }
 0x1fa   :  { %v1315_v25 = vadd.f32 %v1314_v12, %v3488_v63  ;;  %v2726_v60 = vpop.eup %2725  ;;  %2751 = vtanh.f32 %v1090_v52  ;;  %v1093_v13 = vpop.f32.mrf.mxu1 }
 0x1fb   :  { %v1316_v9 = vpop.f32.mrf.mxu0  ;;  %v2728_v3 = vpop.eup %2727  ;;  %2753 = vtanh.f32 %v1092_v57  ;;  %v1094_v36 = vadd.f32 %v1093_v13, %v3481_v61  ;;  %v1591_v23 = vpack.c.bf16 %v2726_v60, %v2720_v51 }
 0x1fc   :  { %v1317_v4 = vadd.f32 %v1316_v9, %v3491_v1  ;;  %v2730_v5 = vpop.eup %2729  ;;  %2755 = vtanh.f32 %v1315_v25  ;;  %v1095_v8 = vpop.f32.mrf.mxu1 }
 0x1fd   :  { %v1318_v10 = vpop.f32.mrf.mxu0  ;;  %v2732_v14 = vpop.eup %2731  ;;  %2757 = vtanh.f32 %v1094_v36  ;;  %v1096_v6 = vadd.f32 %v1095_v8, %v3486_v62  ;;  %v1592_v16 = vpack.c.bf16 %v2730_v5, %v2722_v54 }
 0x1fe   :  { %v1319_v7 = vadd.f32 %v1318_v10, %v3488_v63  ;;  %v2734_v18 = vpop.eup %2733  ;;  %2759 = vtanh.f32 %v1317_v4  ;;  %v1099_v45 = vpop.f32.mrf.mxu1  ;;  %v1594_v59 = vpack.c.bf16 %v2732_v14, %v2724_v56 }
 0x1ff   :  { %v1322_v22 = vpop.f32.mrf.mxu0  ;;  %v2736_v2 = vpop.eup %2735  ;;  %2761 = vtanh.f32 %v1096_v6  ;;  %v1100_v26 = vadd.f32 %v1099_v45, %v3481_v61  ;;  %1990 = vmatprep.mubr.bf16.mxu1 %v1592_v16  ;;  %v1593_v11 = vpack.c.bf16 %v2728_v3, %v2734_v18 }
 0x200   :  { %v2738_v58 = vpop.eup %2737  ;;  %2763 = vtanh.f32 %v1319_v7  ;;  %2175 = vmatprep.mubr.bf16.mxu0 %v1594_v59  ;;  %v1101_v24 = vpop.f32.mrf.mxu1  ;;  %1991 = vmatmul.mubr.bf16.gmra.mxu1 %v1591_v23  ;;  %v1323_v19 = vadd.f32 %v1322_v22, %v3491_v1 }
 0x201   :  { %v1324_v17 = vpop.f32.mrf.mxu0  ;;  %v2740_v27 = vpop.eup %2739  ;;  %2765 = vtanh.f32 %v1313_v33  ;;  %v1102_v28 = vadd.f32 %v1101_v24, %v3486_v62  ;;  %2176 = vmatmul.mubr.bf16.gmra.mxu0 %v1593_v11 }
 0x202   :  { %v1325_v29 = vadd.f32 %v1324_v17, %v3488_v63  ;;  %v2742_v30 = vpop.eup %2741  ;;  %2767 = vtanh.f32 %v1100_v26  ;;  %v1103_v34 = vpop.f32.mrf.mxu1 }
 0x203   :  { %v1326_v37 = vpop.f32.mrf.mxu0  ;;  %v2744_v31 = vpop.eup %2743  ;;  %2769 = vtanh.f32 %v1102_v28  ;;  %v1104_v38 = vadd.f32 %v1103_v34, %v3481_v61  ;;  %v1595_v32 = vpack.c.bf16 %v2742_v30, %v2736_v2 }
 0x204   :  { %v1327_v39 = vadd.f32 %v1326_v37, %v3491_v1  ;;  %v2746_v49 = vpop.eup %2745  ;;  %2771 = vtanh.f32 %v1325_v29  ;;  %v1105_v53 = vpop.f32.mrf.mxu1 }
 0x205   :  { %v1328_v35 = vpop.f32.mrf.mxu0  ;;  %v2748_v55 = vpop.eup %2747  ;;  %2773 = vtanh.f32 %v1104_v38  ;;  %v1106_v40 = vadd.f32 %v1105_v53, %v3486_v62  ;;  %v1596_v43 = vpack.c.bf16 %v2746_v49, %v2738_v58 }
 0x206   :  { %v1329_v41 = vadd.f32 %v1328_v35, %v3488_v63  ;;  %v2750_v44 = vpop.eup %2749  ;;  %2775 = vtanh.f32 %v1327_v39  ;;  %v1109_v47 = vpop.f32.mrf.mxu1  ;;  %v1598_v46 = vpack.c.bf16 %v2748_v55, %v2740_v27 }
 0x207   :  { %v1332_v21 = vpop.f32.mrf.mxu0  ;;  %v2752_v48 = vpop.eup %2751  ;;  %2777 = vtanh.f32 %v1106_v40  ;;  %v1110_v0 = vadd.f32 %v1109_v47, %v3481_v61  ;;  %1998 = vmatprep.mubr.bf16.mxu1 %v1596_v43  ;;  %v1597_v50 = vpack.c.bf16 %v2744_v31, %v2750_v44 }
 0x208   :  { %v2754_v20 = vpop.eup %2753  ;;  %2779 = vtanh.f32 %v1329_v41  ;;  %2183 = vmatprep.mubr.bf16.mxu0 %v1598_v46  ;;  %v1111_v51 = vpop.f32.mrf.mxu1  ;;  %1999 = vmatmul.mubr.bf16.gmra.mxu1 %v1595_v32  ;;  %v1333_v3 = vadd.f32 %v1332_v21, %v3491_v1 }
 0x209   :  { %v1334_v52 = vpop.f32.mrf.mxu0  ;;  %v2756_v42 = vpop.eup %2755  ;;  %2781 = vtanh.f32 %v1323_v19  ;;  %v1112_v54 = vadd.f32 %v1111_v51, %v3486_v62  ;;  %2184 = vmatmul.mubr.bf16.gmra.mxu0 %v1597_v50 }
 0x20a   :  { %v1335_v15 = vadd.f32 %v1334_v52, %v3488_v63  ;;  %v2758_v12 = vpop.eup %2757  ;;  %2783 = vtanh.f32 %v1110_v0  ;;  %v1113_v56 = vpop.f32.mrf.mxu1 }
 0x20b   :  { %v1336_v57 = vpop.f32.mrf.mxu0  ;;  %v2760_v25 = vpop.eup %2759  ;;  %2785 = vtanh.f32 %v1112_v54  ;;  %v1114_v60 = vadd.f32 %v1113_v56, %v3481_v61  ;;  %v1599_v18 = vpack.c.bf16 %v2758_v12, %v2752_v48 }
 0x20c   :  { %v1337_v13 = vadd.f32 %v1336_v57, %v3491_v1  ;;  %v2762_v9 = vpop.eup %2761  ;;  %2787 = vtanh.f32 %v1335_v15  ;;  %v1115_v36 = vpop.f32.mrf.mxu1 }
 0x20d   :  { %v1338_v4 = vpop.f32.mrf.mxu0  ;;  %v2764_v5 = vpop.eup %2763  ;;  %2789 = vtanh.f32 %v1114_v60  ;;  %v1116_v33 = vadd.f32 %v1115_v36, %v3486_v62  ;;  %v1600_v10 = vpack.c.bf16 %v2762_v9, %v2754_v20 }
 0x20e   :  { %v1339_v8 = vadd.f32 %v1338_v4, %v3488_v63  ;;  %v2766_v14 = vpop.eup %2765  ;;  %2791 = vtanh.f32 %v1337_v13  ;;  %v1119_v6 = vpop.f32.mrf.mxu1  ;;  %v1602_v16 = vpack.c.bf16 %v2764_v5, %v2756_v42 }
 0x20f   :  { %v1342_v7 = vpop.f32.mrf.mxu0  ;;  %v2768_v45 = vpop.eup %2767  ;;  %2793 = vtanh.f32 %v1116_v33  ;;  %v1120_v22 = vadd.f32 %v1119_v6, %v3481_v61  ;;  %2006 = vmatprep.mubr.bf16.mxu1 %v1600_v10  ;;  %v1601_v59 = vpack.c.bf16 %v2760_v25, %v2766_v14 }
 0x210   :  { %v2770_v23 = vpop.eup %2769  ;;  %2795 = vtanh.f32 %v1339_v8  ;;  %2191 = vmatprep.mubr.bf16.mxu0 %v1602_v16  ;;  %v1121_v2 = vpop.f32.mrf.mxu1  ;;  %2007 = vmatmul.mubr.bf16.gmra.mxu1 %v1599_v18  ;;  %v1343_v31 = vadd.f32 %v1342_v7, %v3491_v1 }
 0x211   :  { %v1344_v26 = vpop.f32.mrf.mxu0  ;;  %v2772_v11 = vpop.eup %2771  ;;  %2797 = vtanh.f32 %v1333_v3  ;;  %v1122_v58 = vadd.f32 %v1121_v2, %v3486_v62  ;;  %2192 = vmatmul.mubr.bf16.gmra.mxu0 %v1601_v59 }
 0x212   :  { %v1345_v24 = vadd.f32 %v1344_v26, %v3488_v63  ;;  %v2774_v17 = vpop.eup %2773  ;;  %2799 = vtanh.f32 %v1120_v22  ;;  %v1123_v27 = vpop.f32.mrf.mxu1 }
 0x213   :  { %v1346_v28 = vpop.f32.mrf.mxu0  ;;  %v2776_v29 = vpop.eup %2775  ;;  %2801 = vtanh.f32 %v1122_v58  ;;  %v1124_v30 = vadd.f32 %v1123_v27, %v3481_v61  ;;  %v1603_v44 = vpack.c.bf16 %v2774_v17, %v2768_v45 }
 0x214   :  { %v1347_v34 = vadd.f32 %v1346_v28, %v3491_v1  ;;  %v2778_v37 = vpop.eup %2777  ;;  %2803 = vtanh.f32 %v1345_v24  ;;  %v1125_v38 = vpop.f32.mrf.mxu1 }
 0x215   :  { %v1348_v39 = vpop.f32.mrf.mxu0  ;;  %v2780_v49 = vpop.eup %2779  ;;  %2805 = vtanh.f32 %v1124_v30  ;;  %v1126_v19 = vadd.f32 %v1125_v38, %v3486_v62  ;;  %v1604_v35 = vpack.c.bf16 %v2778_v37, %v2770_v23 }
 0x216   :  { %v1349_v53 = vadd.f32 %v1348_v39, %v3488_v63  ;;  %v2782_v55 = vpop.eup %2781  ;;  %2807 = vtanh.f32 %v1347_v34  ;;  %v1129_v40 = vpop.f32.mrf.mxu1  ;;  %v1606_v43 = vpack.c.bf16 %v2780_v49, %v2772_v11 }
 0x217   :  { %v1352_v41 = vpop.f32.mrf.mxu0  ;;  %v2784_v47 = vpop.eup %2783  ;;  %2809 = vtanh.f32 %v1126_v19  ;;  %v1130_v21 = vadd.f32 %v1129_v40, %v3481_v61  ;;  %2014 = vmatprep.mubr.bf16.mxu1 %v1604_v35  ;;  %v1605_v46 = vpack.c.bf16 %v2776_v29, %v2782_v55 }
 0x218   :  { %v2786_v32 = vpop.eup %2785  ;;  %2811 = vtanh.f32 %v1349_v53  ;;  %2199 = vmatprep.mubr.bf16.mxu0 %v1606_v43  ;;  %v1131_v48 = vpop.f32.mrf.mxu1  ;;  %2015 = vmatmul.mubr.bf16.gmra.mxu1 %v1603_v44  ;;  %v1353_v25 = vadd.f32 %v1352_v41, %v3491_v1 }
 0x219   :  { %v1354_v0 = vpop.f32.mrf.mxu0  ;;  %v2788_v50 = vpop.eup %2787  ;;  %2813 = vtanh.f32 %v1343_v31  ;;  %v1132_v20 = vadd.f32 %v1131_v48, %v3486_v62  ;;  %2200 = vmatmul.mubr.bf16.gmra.mxu0 %v1605_v46 }
 0x21a   :  { %v1355_v51 = vadd.f32 %v1354_v0, %v3488_v63  ;;  %v2790_v52 = vpop.eup %2789  ;;  %2815 = vtanh.f32 %v1130_v21  ;;  %v1133_v42 = vpop.f32.mrf.mxu1 }
 0x21b   :  { %v1356_v54 = vpop.f32.mrf.mxu0  ;;  %v2792_v15 = vpop.eup %2791  ;;  %2817 = vtanh.f32 %v1132_v20  ;;  %v1134_v12 = vadd.f32 %v1133_v42, %v3481_v61  ;;  %v1607_v14 = vpack.c.bf16 %v2790_v52, %v2784_v47 }
 0x21c   :  { %v1357_v56 = vadd.f32 %v1356_v54, %v3491_v1  ;;  %v2794_v57 = vpop.eup %2793  ;;  %2819 = vtanh.f32 %v1355_v51  ;;  %v1135_v60 = vpop.f32.mrf.mxu1 }
 0x21d   :  { %v1358_v13 = vpop.f32.mrf.mxu0  ;;  %v2796_v9 = vpop.eup %2795  ;;  %2821 = vtanh.f32 %v1134_v12  ;;  %v1136_v3 = vadd.f32 %v1135_v60, %v3486_v62  ;;  %v1608_v4 = vpack.c.bf16 %v2794_v57, %v2786_v32 }
 0x21e   :  { %v1359_v36 = vadd.f32 %v1358_v13, %v3488_v63  ;;  %v2798_v5 = vpop.eup %2797  ;;  %2823 = vtanh.f32 %v1357_v56  ;;  %v1139_v33 = vpop.f32.mrf.mxu1  ;;  %v1610_v10 = vpack.c.bf16 %v2796_v9, %v2788_v50 }
 0x21f   :  { %v1362_v8 = vpop.f32.mrf.mxu0  ;;  %v2800_v6 = vpop.eup %2799  ;;  %2825 = vtanh.f32 %v1136_v3  ;;  %v1140_v7 = vadd.f32 %v1139_v33, %v3481_v61  ;;  %2022 = vmatprep.mubr.bf16.mxu1 %v1608_v4  ;;  %v1609_v16 = vpack.c.bf16 %v2792_v15, %v2798_v5 }
 0x220   :  { %v2802_v18 = vpop.eup %2801  ;;  %2827 = vtanh.f32 %v1359_v36  ;;  %2207 = vmatprep.mubr.bf16.mxu0 %v1610_v10  ;;  %v1141_v45 = vpop.f32.mrf.mxu1  ;;  %2023 = vmatmul.mubr.bf16.gmra.mxu1 %v1607_v14  ;;  %v1363_v29 = vadd.f32 %v1362_v8, %v3491_v1 }
 0x221   :  { %v1364_v22 = vpop.f32.mrf.mxu0  ;;  %v2804_v59 = vpop.eup %2803  ;;  %2829 = vtanh.f32 %v1353_v25  ;;  %v1142_v23 = vadd.f32 %v1141_v45, %v3486_v62  ;;  %2208 = vmatmul.mubr.bf16.gmra.mxu0 %v1609_v16 }
 0x222   :  { %v1365_v2 = vadd.f32 %v1364_v22, %v3488_v63  ;;  %v2806_v26 = vpop.eup %2805  ;;  %2831 = vtanh.f32 %v1140_v7  ;;  %v1143_v11 = vpop.f32.mrf.mxu1 }
 0x223   :  { %v1366_v58 = vpop.f32.mrf.mxu0  ;;  %v2808_v24 = vpop.eup %2807  ;;  %2833 = vtanh.f32 %v1142_v23  ;;  %v1144_v17 = vadd.f32 %v1143_v11, %v3481_v61  ;;  %v1611_v55 = vpack.c.bf16 %v2806_v26, %v2800_v6 }
 0x224   :  { %v1367_v27 = vadd.f32 %v1366_v58, %v3491_v1  ;;  %v2810_v28 = vpop.eup %2809  ;;  %2835 = vtanh.f32 %v1365_v2  ;;  %v1145_v30 = vpop.f32.mrf.mxu1 }
 0x225   :  { %v1368_v34 = vpop.f32.mrf.mxu0  ;;  %v2812_v37 = vpop.eup %2811  ;;  %2837 = vtanh.f32 %v1144_v17  ;;  %v1146_v31 = vadd.f32 %v1145_v30, %v3486_v62  ;;  %v1612_v39 = vpack.c.bf16 %v2810_v28, %v2802_v18 }
 0x226   :  { %v1369_v38 = vadd.f32 %v1368_v34, %v3488_v63  ;;  %v2814_v49 = vpop.eup %2813  ;;  %2839 = vtanh.f32 %v1367_v27  ;;  %v1149_v19 = vpop.f32.mrf.mxu1  ;;  %v1614_v35 = vpack.c.bf16 %v2812_v37, %v2804_v59 }
 0x227   :  { %v1372_v53 = vpop.f32.mrf.mxu0  ;;  %v2816_v40 = vpop.eup %2815  ;;  %2841 = vtanh.f32 %v1146_v31  ;;  %v1150_v41 = vadd.f32 %v1149_v19, %v3481_v61  ;;  %2030 = vmatprep.mubr.bf16.mxu1 %v1612_v39  ;;  %v1613_v43 = vpack.c.bf16 %v2808_v24, %v2814_v49 }
 0x228   :  { %v2818_v44 = vpop.eup %2817  ;;  %2843 = vtanh.f32 %v1369_v38  ;;  %2215 = vmatprep.mubr.bf16.mxu0 %v1614_v35  ;;  %v1151_v47 = vpop.f32.mrf.mxu1  ;;  %2031 = vmatmul.mubr.bf16.gmra.mxu1 %v1611_v55  ;;  %v1373_v15 = vadd.f32 %v1372_v53, %v3491_v1 }
 0x229   :  { %v1374_v21 = vpop.f32.mrf.mxu0  ;;  %v2820_v46 = vpop.eup %2819  ;;  %2845 = vtanh.f32 %v1363_v29  ;;  %v1152_v32 = vadd.f32 %v1151_v47, %v3486_v62  ;;  %2216 = vmatmul.mubr.bf16.gmra.mxu0 %v1613_v43 }
 0x22a   :  { %v1375_v48 = vadd.f32 %v1374_v21, %v3488_v63  ;;  %v2822_v0 = vpop.eup %2821  ;;  %2847 = vtanh.f32 %v1150_v41  ;;  %v1153_v50 = vpop.f32.mrf.mxu1 }
 0x22b   :  { %v1376_v20 = vpop.f32.mrf.mxu0  ;;  %v2824_v51 = vpop.eup %2823  ;;  %2849 = vtanh.f32 %v1152_v32  ;;  %v1154_v52 = vadd.f32 %v1153_v50, %v3481_v61  ;;  %v1615_v5 = vpack.c.bf16 %v2822_v0, %v2816_v40 }
 0x22c   :  { %v1377_v42 = vadd.f32 %v1376_v20, %v3491_v1  ;;  %v2826_v54 = vpop.eup %2825  ;;  %2851 = vtanh.f32 %v1375_v48  ;;  %v1155_v12 = vpop.f32.mrf.mxu1 }
 0x22d   :  { %v1378_v56 = vpop.f32.mrf.mxu0  ;;  %v2828_v57 = vpop.eup %2827  ;;  %2853 = vtanh.f32 %v1154_v52  ;;  %v1156_v25 = vadd.f32 %v1155_v12, %v3486_v62  ;;  %v1616_v13 = vpack.c.bf16 %v2826_v54, %v2818_v44 }
 0x22e   :  { %v1379_v60 = vadd.f32 %v1378_v56, %v3488_v63  ;;  %v2830_v9 = vpop.eup %2829  ;;  %2855 = vtanh.f32 %v1377_v42  ;;  %v1159_v3 = vpop.f32.mrf.mxu1  ;;  %v1618_v4 = vpack.c.bf16 %v2828_v57, %v2820_v46 }
 0x22f   :  { %v1382_v36 = vpop.f32.mrf.mxu0  ;;  %v2832_v33 = vpop.eup %2831  ;;  %2857 = vtanh.f32 %v1156_v25  ;;  %v1160_v8 = vadd.f32 %v1159_v3, %v3481_v61  ;;  %2038 = vmatprep.mubr.bf16.mxu1 %v1616_v13  ;;  %v1617_v10 = vpack.c.bf16 %v2824_v51, %v2830_v9 }
 0x230   :  { %v2834_v14 = vpop.eup %2833  ;;  %2859 = vtanh.f32 %v1379_v60  ;;  %2223 = vmatprep.mubr.bf16.mxu0 %v1618_v4  ;;  %v1161_v6 = vpop.f32.mrf.mxu1  ;;  %2039 = vmatmul.mubr.bf16.gmra.mxu1 %v1615_v5  ;;  %v1383_v24 = vadd.f32 %v1382_v36, %v3491_v1 }
 0x231   :  { %v1384_v7 = vpop.f32.mrf.mxu0  ;;  %v2836_v16 = vpop.eup %2835  ;;  %2861 = vtanh.f32 %v1373_v15  ;;  %v1162_v18 = vadd.f32 %v1161_v6, %v3486_v62  ;;  %2224 = vmatmul.mubr.bf16.gmra.mxu0 %v1617_v10 }
 0x232   :  { %v1385_v45 = vadd.f32 %v1384_v7, %v3488_v63  ;;  %v2838_v22 = vpop.eup %2837  ;;  %2863 = vtanh.f32 %v1160_v8  ;;  %v1163_v59 = vpop.f32.mrf.mxu1 }
 0x233   :  { %v1386_v23 = vpop.f32.mrf.mxu0  ;;  %v2840_v2 = vpop.eup %2839  ;;  %2865 = vtanh.f32 %v1162_v18  ;;  %v1164_v26 = vadd.f32 %v1163_v59, %v3481_v61  ;;  %v1619_v49 = vpack.c.bf16 %v2838_v22, %v2832_v33 }
 0x234   :  { %v1387_v11 = vadd.f32 %v1386_v23, %v3491_v1  ;;  %v2842_v58 = vpop.eup %2841  ;;  %2867 = vtanh.f32 %v1385_v45  ;;  %v1165_v17 = vpop.f32.mrf.mxu1 }
 0x235   :  { %v1388_v27 = vpop.f32.mrf.mxu0  ;;  %v2844_v28 = vpop.eup %2843  ;;  %2869 = vtanh.f32 %v1164_v26  ;;  %v1166_v29 = vadd.f32 %v1165_v17, %v3486_v62  ;;  %v1620_v34 = vpack.c.bf16 %v2842_v58, %v2834_v14 }
 0x236   :  { %v1389_v30 = vadd.f32 %v1388_v27, %v3488_v63  ;;  %v2846_v37 = vpop.eup %2845  ;;  %2871 = vtanh.f32 %v1387_v11  ;;  %v1169_v31 = vpop.f32.mrf.mxu1  ;;  %v1622_v39 = vpack.c.bf16 %v2844_v28, %v2836_v16 }
 0x237   :  { %v1392_v38 = vpop.f32.mrf.mxu0  ;;  %v2848_v19 = vpop.eup %2847  ;;  %2873 = vtanh.f32 %v1166_v29  ;;  %v1170_v53 = vadd.f32 %v1169_v31, %v3481_v61  ;;  %2046 = vmatprep.mubr.bf16.mxu1 %v1620_v34  ;;  %v1621_v35 = vpack.c.bf16 %v2840_v2, %v2846_v37 }
 0x238   :  { %v2850_v55 = vpop.eup %2849  ;;  %2875 = vtanh.f32 %v1389_v30  ;;  %2231 = vmatprep.mubr.bf16.mxu0 %v1622_v39  ;;  %v1171_v40 = vpop.f32.mrf.mxu1  ;;  %2047 = vmatmul.mubr.bf16.gmra.mxu1 %v1619_v49  ;;  %v1393_v51 = vadd.f32 %v1392_v38, %v3491_v1 }
 0x239   :  { %v1394_v41 = vpop.f32.mrf.mxu0  ;;  %v2852_v43 = vpop.eup %2851  ;;  %2877 = vtanh.f32 %v1383_v24  ;;  %v1172_v44 = vadd.f32 %v1171_v40, %v3486_v62  ;;  %2232 = vmatmul.mubr.bf16.gmra.mxu0 %v1621_v35 }
 0x23a   :  { %v1395_v47 = vadd.f32 %v1394_v41, %v3488_v63  ;;  %v2854_v21 = vpop.eup %2853  ;;  %2879 = vtanh.f32 %v1170_v53  ;;  %v1173_v46 = vpop.f32.mrf.mxu1 }
 0x23b   :  { %v1396_v32 = vpop.f32.mrf.mxu0  ;;  %v2856_v48 = vpop.eup %2855  ;;  %2881 = vtanh.f32 %v1172_v44  ;;  %v1174_v0 = vadd.f32 %v1173_v46, %v3481_v61  ;;  %v1623_v9 = vpack.c.bf16 %v2854_v21, %v2848_v19 }
 0x23c   :  { %v1397_v50 = vadd.f32 %v1396_v32, %v3491_v1  ;;  %v2858_v20 = vpop.eup %2857  ;;  %2883 = vtanh.f32 %v1395_v47  ;;  %v1175_v52 = vpop.f32.mrf.mxu1 }
 0x23d   :  { %v1398_v42 = vpop.f32.mrf.mxu0  ;;  %v2860_v54 = vpop.eup %2859  ;;  %2885 = vtanh.f32 %v1174_v0  ;;  %v1176_v15 = vadd.f32 %v1175_v52, %v3486_v62  ;;  %v1624_v56 = vpack.c.bf16 %v2858_v20, %v2850_v55  ;;  %v3647_v20 = vld [vmem:[%s3696_s6] ss:$0 sm:$0xff]  ;;  %s2959_s6 = smov [#allocation5]  }
 0x23e   :  { %v1399_v12 = vadd.f32 %v1398_v42, %v3488_v63  ;;  %v2862_v57 = vpop.eup %2861  ;;  %2887 = vtanh.f32 %v1397_v50  ;;  %v1179_v25 = vpop.f32.mrf.mxu1  ;;  %v1626_v13 = vpack.c.bf16 %v2860_v54, %v2852_v43  ;;  %s2315_s12 = sshll.u32 %s2959_s6, 4  ;;  %s2316_s12 = int_to_ptr.vmem [resolvable:$true] %s2315_s12 }
 0x23f   :  { %v1402_v60 = vpop.f32.mrf.mxu0  ;;  %v2864_v3 = vpop.eup %2863  ;;  %2889 = vtanh.f32 %v1176_v15  ;;  %v1180_v36 = vadd.f32 %v1179_v25, %v3481_v61  ;;  %2054 = vmatprep.mubr.bf16.mxu1 %v1624_v56  ;;  %v1625_v4 = vpack.c.bf16 %v2856_v48, %v2862_v57  ;;  %s2931_s13 = scalar_lea.vmem %s2316_s12, 4864  ;;  %p2936_p6 = scmp.lt.s32.totalorder %s2316_s12, %s2316_s12 }
 0x240   :  { %v2866_v5 = vpop.eup %2865  ;;  %2891 = vtanh.f32 %v1399_v12  ;;  %2239 = vmatprep.mubr.bf16.mxu0 %v1626_v13  ;;  %v1181_v33 = vpop.f32.mrf.mxu1  ;;  %2055 = vmatmul.mubr.bf16.gmra.mxu1 %v1623_v9  ;;  %v1403_v2 = vadd.f32 %v1402_v60, %v3491_v1  ;;  %p2932_p5 = scmp.ne.s32.totalorder %s2316_s12, %s2931_s13  ;;  %p2937_p7 = scmp.lt.s32.totalorder %s2931_s13, %s2931_s13 }
 0x241   :  { %v1404_v8 = vpop.f32.mrf.mxu0  ;;  %v2868_v10 = vpop.eup %2867  ;;  %2893 = vtanh.f32 %v1393_v51  ;;  %v1182_v14 = vadd.f32 %v1181_v33, %v3486_v62  ;;  %2240 = vmatmul.mubr.bf16.gmra.mxu0 %v1625_v4 }
 0x242   :  { %v1405_v6 = vadd.f32 %v1404_v8, %v3488_v63  ;;  %v2870_v7 = vpop.eup %2869  ;;  %2895 = vtanh.f32 %v1180_v36  ;;  %v1183_v16 = vpop.f32.mrf.mxu1  ;;  %p2938_p8 = por %p2937_p7, %p2936_p6 }
 0x243   :  { %v1406_v18 = vpop.f32.mrf.mxu0  ;;  %v2872_v45 = vpop.eup %2871  ;;  %2897 = vtanh.f32 %v1182_v14  ;;  %v1184_v22 = vadd.f32 %v1183_v16, %v3481_v61  ;;  %v1627_v30 = vpack.c.bf16 %v2870_v7, %v2864_v3 }
 0x244   :  { %v1407_v59 = vadd.f32 %v1406_v18, %v3491_v1  ;;  %v2874_v23 = vpop.eup %2873  ;;  %2899 = vtanh.f32 %v1405_v6  ;;  %v1185_v26 = vpop.f32.mrf.mxu1  ;;  %p2939_p9 = pnand %p2938_p8, %p2932_p5 }
 0x245   :  { %v1408_v11 = vpop.f32.mrf.mxu0  ;;  %v2876_v58 = vpop.eup %2875  ;;  %2901 = vtanh.f32 %v1184_v22  ;;  %v1186_v24 = vadd.f32 %v1185_v26, %v3486_v62  ;;  %v1628_v27 = vpack.c.bf16 %v2874_v23, %v2866_v5 }
 0x246   :  { %v1409_v17 = vadd.f32 %v1408_v11, %v3488_v63  ;;  %v2878_v28 = vpop.eup %2877  ;;  %2903 = vtanh.f32 %v1407_v59  ;;  %v1630_v29 = vpack.c.bf16 %v2876_v58, %v2868_v10 }
 0x247   :  { %v2880_v61 = vpop.eup %2879  ;;  %2905 = vtanh.f32 %v1186_v24  ;;  %2062 = vmatprep.mubr.bf16.mxu1 %v1628_v27  ;;  %v1629_v34 = vpack.c.bf16 %v2872_v45, %v2878_v28 }
 0x248   :  { %v2882_v37 = vpop.eup %2881  ;;  %2907 = vtanh.f32 %v1409_v17  ;;  %2247 = vmatprep.mubr.bf16.mxu0 %v1630_v29  ;;  %2063 = vmatmul.mubr.bf16.gmra.mxu1 %v1627_v30 }
 0x249   :  { %v2884_v1 = vpop.eup %2883  ;;  %2909 = vtanh.f32 %v1403_v2  ;;  %2248 = vmatmul.mubr.bf16.gmra.mxu0 %v1629_v34 }
 0x24a   :  { %v2886_v31 = vpop.eup %2885 }
 0x24b   :  { %v2888_v62 = vpop.eup %2887  ;;  %v1631_v53 = vpack.c.bf16 %v2886_v31, %v2880_v61 }
 0x24c   :  { %v2890_v38 = vpop.eup %2889 }
 0x24d   :  { %v2892_v63 = vpop.eup %2891  ;;  %v1632_v39 = vpack.c.bf16 %v2890_v38, %v2882_v37 }
 0x24e   :  { %v2894_v49 = vpop.eup %2893  ;;  %v1634_v19 = vpack.c.bf16 %v2892_v63, %v2884_v1 }
 0x24f   :  { %v2896_v35 = vpop.eup %2895  ;;  %2070 = vmatprep.mubr.bf16.mxu1 %v1632_v39  ;;  %v1633_v55 = vpack.c.bf16 %v2888_v62, %v2894_v49 }
 0x250   :  { %v2898_v40 = vpop.eup %2897  ;;  %2255 = vmatprep.mubr.bf16.mxu0 %v1634_v19  ;;  %2071 = vmatmul.mubr.bf16.gmra.mxu1 %v1631_v53 }
 0x251   :  { %v2900_v41 = vpop.eup %2899  ;;  %2256 = vmatmul.mubr.bf16.gmra.mxu0 %v1633_v55 }
 0x252   :  { %v2902_v43 = vpop.eup %2901 }
 0x253   :  { %v2904_v44 = vpop.eup %2903  ;;  %v1635_v0 = vpack.c.bf16 %v2902_v43, %v2896_v35 }
 0x254   :  { %v2906_v47 = vpop.eup %2905 }
 0x255   :  { %v2908_v21 = vpop.eup %2907  ;;  %v1636_v46 = vpack.c.bf16 %v2906_v47, %v2898_v40 }
 0x256   :  { %v2910_v32 = vpop.eup %2909  ;;  %v1638_v48 = vpack.c.bf16 %v2908_v21, %v2900_v41 }
 0x257   :  { %2078 = vmatprep.mubr.bf16.mxu1 %v1636_v46  ;;  %v1637_v50 = vpack.c.bf16 %v2904_v44, %v2910_v32 }
 0x258   :  { %2263 = vmatprep.mubr.bf16.mxu0 %v1638_v48  ;;  %2079 = vmatmul.mubr.bf16.gmra.mxu1 %v1635_v0 }
 0x259   :  { %2264 = vmatmul.mubr.bf16.gmra.mxu0 %v1637_v50 }
 0x288   :  { %v1936_v51 = vpop.f32.mrf.mxu1 }
 0x289   :  { %v1937_v52 = vadd.f32 %v3647_v20, %v1936_v51  ;;  %v2121_v42 = vpop.f32.mrf.mxu0 }
 0x28a   :  { %v1938_v54 = vpop.f32.mrf.mxu1 }
 0x28b   :  { %v2122_v15 = vadd.f32 %v2121_v42, %v1937_v52  ;;  %v2123_v12 = vpop.f32.mrf.mxu0 }
 0x28c   :  { %v1939_v56 = vpop.f32.mrf.mxu1 }
 0x28d   :  { %2272 = vst [vmem:[#allocation5] sm:$0xff] %v2122_v15  ;;  %v1940_v57 = vadd.f32 %v3647_v20, %v1939_v56  ;;  %v2124_v25 = vpop.f32.mrf.mxu0 }
 0x28e   :  { %v1941_v60 = vpop.f32.mrf.mxu1 }
 0x28f   :  { %v2125_v13 = vadd.f32 %v2124_v25, %v1940_v57  ;;  %v2126_v9 = vpop.f32.mrf.mxu0 }
 0x290   :  { %v1944_v3 = vpop.f32.mrf.mxu1 }
 0x291   :  { %2273 = vst [vmem:[#allocation5 + $0x8] sm:$0xff] %v2125_v13  ;;  %v1945_v36 = vadd.f32 %v3647_v20, %v1944_v3  ;;  %v2129_v4 = vpop.f32.mrf.mxu0 }
 0x292   :  { %v1946_v5 = vpop.f32.mrf.mxu1 }
 0x293   :  { %v2130_v33 = vadd.f32 %v2129_v4, %v1945_v36  ;;  %v2131_v8 = vpop.f32.mrf.mxu0 }
 0x294   :  { %v1947_v10 = vpop.f32.mrf.mxu1 }
 0x295   :  { %2274 = vst [vmem:[#allocation5 + $0x10] sm:$0xff] %v2130_v33  ;;  %v1948_v14 = vadd.f32 %v3647_v20, %v1947_v10  ;;  %v2132_v6 = vpop.f32.mrf.mxu0 }
 0x296   :  { %v1949_v7 = vpop.f32.mrf.mxu1 }
 0x297   :  { %v2133_v16 = vadd.f32 %v2132_v6, %v1948_v14  ;;  %v2134_v18 = vpop.f32.mrf.mxu0 }
 0x298   :  { %v1952_v45 = vpop.f32.mrf.mxu1 }
 0x299   :  { %2275 = vst [vmem:[#allocation5 + $0x18] sm:$0xff] %v2133_v16  ;;  %v1953_v22 = vadd.f32 %v3647_v20, %v1952_v45  ;;  %v2137_v59 = vpop.f32.mrf.mxu0 }
 0x29a   :  { %v1954_v23 = vpop.f32.mrf.mxu1 }
 0x29b   :  { %v2138_v2 = vadd.f32 %v2137_v59, %v1953_v22  ;;  %v2139_v26 = vpop.f32.mrf.mxu0 }
 0x29c   :  { %v1955_v11 = vpop.f32.mrf.mxu1 }
 0x29d   :  { %2276 = vst [vmem:[#allocation5 + $0x20] sm:$0xff] %v2138_v2  ;;  %v1956_v58 = vadd.f32 %v3647_v20, %v1955_v11  ;;  %v2140_v24 = vpop.f32.mrf.mxu0 }
 0x29e   :  { %v1957_v17 = vpop.f32.mrf.mxu1 }
 0x29f   :  { %v2141_v27 = vadd.f32 %v2140_v24, %v1956_v58  ;;  %v2142_v28 = vpop.f32.mrf.mxu0 }
 0x2a0   :  { %v1960_v29 = vpop.f32.mrf.mxu1 }
 0x2a1   :  { %2277 = vst [vmem:[#allocation5 + $0x28] sm:$0xff] %v2141_v27  ;;  %v1961_v30 = vadd.f32 %v3647_v20, %v1960_v29  ;;  %v2145_v61 = vpop.f32.mrf.mxu0 }
 0x2a2   :  { %v1962_v34 = vpop.f32.mrf.mxu1 }
 0x2a3   :  { %v2146_v37 = vadd.f32 %v2145_v61, %v1961_v30  ;;  %v2147_v1 = vpop.f32.mrf.mxu0 }
 0x2a4   :  { %v1963_v31 = vpop.f32.mrf.mxu1 }
 0x2a5   :  { %2278 = vst [vmem:[#allocation5 + $0x30] sm:$0xff] %v2146_v37  ;;  %v1964_v62 = vadd.f32 %v3647_v20, %v1963_v31  ;;  %v2148_v38 = vpop.f32.mrf.mxu0 }
 0x2a6   :  { %v1965_v63 = vpop.f32.mrf.mxu1 }
 0x2a7   :  { %v2149_v39 = vadd.f32 %v2148_v38, %v1964_v62  ;;  %v2150_v49 = vpop.f32.mrf.mxu0 }
 0x2a8   :  { %v1968_v19 = vpop.f32.mrf.mxu1 }
 0x2a9   :  { %2279 = vst [vmem:[#allocation5 + $0x38] sm:$0xff] %v2149_v39  ;;  %v1969_v53 = vadd.f32 %v3647_v20, %v1968_v19  ;;  %v2153_v35 = vpop.f32.mrf.mxu0 }
 0x2aa   :  { %v1970_v55 = vpop.f32.mrf.mxu1 }
 0x2ab   :  { %v2154_v40 = vadd.f32 %v2153_v35, %v1969_v53  ;;  %v2155_v41 = vpop.f32.mrf.mxu0 }
 0x2ac   :  { %v1971_v43 = vpop.f32.mrf.mxu1 }
 0x2ad   :  { %2280 = vst [vmem:[#allocation5 + $0x40] sm:$0xff] %v2154_v40  ;;  %v1972_v44 = vadd.f32 %v3647_v20, %v1971_v43  ;;  %v2156_v47 = vpop.f32.mrf.mxu0 }
 0x2ae   :  { %v1973_v21 = vpop.f32.mrf.mxu1 }
 0x2af   :  { %v2157_v46 = vadd.f32 %v2156_v47, %v1972_v44  ;;  %v2158_v32 = vpop.f32.mrf.mxu0 }
 0x2b0   :  { %v1976_v48 = vpop.f32.mrf.mxu1 }
 0x2b1   :  { %2281 = vst [vmem:[#allocation5 + $0x48] sm:$0xff] %v2157_v46  ;;  %v1977_v0 = vadd.f32 %v3647_v20, %v1976_v48  ;;  %v2161_v50 = vpop.f32.mrf.mxu0 }
 0x2b2   :  { %v1978_v51 = vpop.f32.mrf.mxu1 }
 0x2b3   :  { %v2162_v52 = vadd.f32 %v2161_v50, %v1977_v0  ;;  %v2163_v42 = vpop.f32.mrf.mxu0 }
 0x2b4   :  { %v1979_v54 = vpop.f32.mrf.mxu1 }
 0x2b5   :  { %2282 = vst [vmem:[#allocation5 + $0x50] sm:$0xff] %v2162_v52  ;;  %v1980_v15 = vadd.f32 %v3647_v20, %v1979_v54  ;;  %v2164_v12 = vpop.f32.mrf.mxu0 }
 0x2b6   :  { %v1981_v56 = vpop.f32.mrf.mxu1 }
 0x2b7   :  { %v2165_v57 = vadd.f32 %v2164_v12, %v1980_v15  ;;  %v2166_v25 = vpop.f32.mrf.mxu0 }
 0x2b8   :  { %v1984_v60 = vpop.f32.mrf.mxu1 }
 0x2b9   :  { %2283 = vst [vmem:[#allocation5 + $0x58] sm:$0xff] %v2165_v57  ;;  %v1985_v13 = vadd.f32 %v3647_v20, %v1984_v60  ;;  %v2169_v9 = vpop.f32.mrf.mxu0 }
 0x2ba   :  { %v1986_v3 = vpop.f32.mrf.mxu1 }
 0x2bb   :  { %v2170_v36 = vadd.f32 %v2169_v9, %v1985_v13  ;;  %v2171_v4 = vpop.f32.mrf.mxu0 }
 0x2bc   :  { %v1987_v5 = vpop.f32.mrf.mxu1 }
 0x2bd   :  { %2284 = vst [vmem:[#allocation5 + $0x60] sm:$0xff] %v2170_v36  ;;  %v1988_v33 = vadd.f32 %v3647_v20, %v1987_v5  ;;  %v2172_v8 = vpop.f32.mrf.mxu0 }
 0x2be   :  { %v1989_v10 = vpop.f32.mrf.mxu1 }
 0x2bf   :  { %v2173_v14 = vadd.f32 %v2172_v8, %v1988_v33  ;;  %v2174_v6 = vpop.f32.mrf.mxu0 }
 0x2c0   :  { %v1992_v7 = vpop.f32.mrf.mxu1 }
 0x2c1   :  { %2285 = vst [vmem:[#allocation5 + $0x68] sm:$0xff] %v2173_v14  ;;  %v1993_v16 = vadd.f32 %v3647_v20, %v1992_v7  ;;  %v2177_v18 = vpop.f32.mrf.mxu0 }
 0x2c2   :  { %v1994_v45 = vpop.f32.mrf.mxu1 }
 0x2c3   :  { %v2178_v22 = vadd.f32 %v2177_v18, %v1993_v16  ;;  %v2179_v59 = vpop.f32.mrf.mxu0 }
 0x2c4   :  { %v1995_v23 = vpop.f32.mrf.mxu1 }
 0x2c5   :  { %2286 = vst [vmem:[#allocation5 + $0x70] sm:$0xff] %v2178_v22  ;;  %v1996_v2 = vadd.f32 %v3647_v20, %v1995_v23  ;;  %v2180_v26 = vpop.f32.mrf.mxu0 }
 0x2c6   :  { %v1997_v11 = vpop.f32.mrf.mxu1 }
 0x2c7   :  { %v2181_v58 = vadd.f32 %v2180_v26, %v1996_v2  ;;  %v2182_v24 = vpop.f32.mrf.mxu0 }
 0x2c8   :  { %v2000_v17 = vpop.f32.mrf.mxu1 }
 0x2c9   :  { %2287 = vst [vmem:[#allocation5 + $0x78] sm:$0xff] %v2181_v58  ;;  %v2001_v27 = vadd.f32 %v3647_v20, %v2000_v17  ;;  %v2185_v28 = vpop.f32.mrf.mxu0 }
 0x2ca   :  { %v2002_v29 = vpop.f32.mrf.mxu1 }
 0x2cb   :  { %v2186_v30 = vadd.f32 %v2185_v28, %v2001_v27  ;;  %v2187_v61 = vpop.f32.mrf.mxu0 }
 0x2cc   :  { %v2003_v34 = vpop.f32.mrf.mxu1 }
 0x2cd   :  { %2288 = vst [vmem:[#allocation5 + $0x80] sm:$0xff] %v2186_v30  ;;  %v2004_v37 = vadd.f32 %v3647_v20, %v2003_v34  ;;  %v2188_v1 = vpop.f32.mrf.mxu0 }
 0x2ce   :  { %v2005_v31 = vpop.f32.mrf.mxu1 }
 0x2cf   :  { %v2189_v62 = vadd.f32 %v2188_v1, %v2004_v37  ;;  %v2190_v38 = vpop.f32.mrf.mxu0 }
 0x2d0   :  { %v2008_v63 = vpop.f32.mrf.mxu1 }
 0x2d1   :  { %2289 = vst [vmem:[#allocation5 + $0x88] sm:$0xff] %v2189_v62  ;;  %v2009_v39 = vadd.f32 %v3647_v20, %v2008_v63  ;;  %v2193_v49 = vpop.f32.mrf.mxu0 }
 0x2d2   :  { %v2010_v19 = vpop.f32.mrf.mxu1 }
 0x2d3   :  { %v2194_v53 = vadd.f32 %v2193_v49, %v2009_v39  ;;  %v2195_v35 = vpop.f32.mrf.mxu0 }
 0x2d4   :  { %v2011_v55 = vpop.f32.mrf.mxu1 }
 0x2d5   :  { %2290 = vst [vmem:[#allocation5 + $0x90] sm:$0xff] %v2194_v53  ;;  %v2012_v40 = vadd.f32 %v3647_v20, %v2011_v55  ;;  %v2196_v41 = vpop.f32.mrf.mxu0 }
 0x2d6   :  { %v2013_v43 = vpop.f32.mrf.mxu1 }
 0x2d7   :  { %v2197_v44 = vadd.f32 %v2196_v41, %v2012_v40  ;;  %v2198_v47 = vpop.f32.mrf.mxu0 }
 0x2d8   :  { %v2016_v21 = vpop.f32.mrf.mxu1 }
 0x2d9   :  { %2291 = vst [vmem:[#allocation5 + $0x98] sm:$0xff] %v2197_v44  ;;  %v2017_v46 = vadd.f32 %v3647_v20, %v2016_v21  ;;  %v2201_v32 = vpop.f32.mrf.mxu0 }
 0x2da   :  { %v2018_v48 = vpop.f32.mrf.mxu1 }
 0x2db   :  { %v2202_v0 = vadd.f32 %v2201_v32, %v2017_v46  ;;  %v2203_v50 = vpop.f32.mrf.mxu0 }
 0x2dc   :  { %v2019_v51 = vpop.f32.mrf.mxu1 }
 0x2dd   :  { %2292 = vst [vmem:[#allocation5 + $0xa0] sm:$0xff] %v2202_v0  ;;  %v2020_v52 = vadd.f32 %v3647_v20, %v2019_v51  ;;  %v2204_v42 = vpop.f32.mrf.mxu0 }
 0x2de   :  { %v2021_v54 = vpop.f32.mrf.mxu1 }
 0x2df   :  { %v2205_v15 = vadd.f32 %v2204_v42, %v2020_v52  ;;  %v2206_v12 = vpop.f32.mrf.mxu0 }
 0x2e0   :  { %v2024_v56 = vpop.f32.mrf.mxu1 }
 0x2e1   :  { %2293 = vst [vmem:[#allocation5 + $0xa8] sm:$0xff] %v2205_v15  ;;  %v2025_v57 = vadd.f32 %v3647_v20, %v2024_v56  ;;  %v2209_v25 = vpop.f32.mrf.mxu0 }
 0x2e2   :  { %v2026_v60 = vpop.f32.mrf.mxu1 }
 0x2e3   :  { %v2210_v13 = vadd.f32 %v2209_v25, %v2025_v57  ;;  %v2211_v9 = vpop.f32.mrf.mxu0 }
 0x2e4   :  { %v2027_v3 = vpop.f32.mrf.mxu1 }
 0x2e5   :  { %2294 = vst [vmem:[#allocation5 + $0xb0] sm:$0xff] %v2210_v13  ;;  %v2028_v36 = vadd.f32 %v3647_v20, %v2027_v3  ;;  %v2212_v4 = vpop.f32.mrf.mxu0 }
 0x2e6   :  { %v2029_v5 = vpop.f32.mrf.mxu1 }
 0x2e7   :  { %v2213_v33 = vadd.f32 %v2212_v4, %v2028_v36  ;;  %v2214_v8 = vpop.f32.mrf.mxu0 }
 0x2e8   :  { %v2032_v10 = vpop.f32.mrf.mxu1 }
 0x2e9   :  { %2295 = vst [vmem:[#allocation5 + $0xb8] sm:$0xff] %v2213_v33  ;;  %v2033_v14 = vadd.f32 %v3647_v20, %v2032_v10  ;;  %v2217_v6 = vpop.f32.mrf.mxu0 }
 0x2ea   :  { %v2034_v7 = vpop.f32.mrf.mxu1 }
 0x2eb   :  { %v2218_v16 = vadd.f32 %v2217_v6, %v2033_v14  ;;  %v2219_v18 = vpop.f32.mrf.mxu0 }
 0x2ec   :  { %v2035_v45 = vpop.f32.mrf.mxu1 }
 0x2ed   :  { %2296 = vst [vmem:[#allocation5 + $0xc0] sm:$0xff] %v2218_v16  ;;  %v2036_v22 = vadd.f32 %v3647_v20, %v2035_v45  ;;  %v2220_v59 = vpop.f32.mrf.mxu0 }
 0x2ee   :  { %v2037_v23 = vpop.f32.mrf.mxu1 }
 0x2ef   :  { %v2221_v2 = vadd.f32 %v2220_v59, %v2036_v22  ;;  %v2222_v26 = vpop.f32.mrf.mxu0 }
 0x2f0   :  { %v2040_v11 = vpop.f32.mrf.mxu1 }
 0x2f1   :  { %2297 = vst [vmem:[#allocation5 + $0xc8] sm:$0xff] %v2221_v2  ;;  %v2041_v58 = vadd.f32 %v3647_v20, %v2040_v11  ;;  %v2225_v24 = vpop.f32.mrf.mxu0 }
 0x2f2   :  { %v2042_v17 = vpop.f32.mrf.mxu1 }
 0x2f3   :  { %v2226_v27 = vadd.f32 %v2225_v24, %v2041_v58  ;;  %v2227_v28 = vpop.f32.mrf.mxu0 }
 0x2f4   :  { %v2043_v29 = vpop.f32.mrf.mxu1 }
 0x2f5   :  { %2298 = vst [vmem:[#allocation5 + $0xd0] sm:$0xff] %v2226_v27  ;;  %v2044_v30 = vadd.f32 %v3647_v20, %v2043_v29  ;;  %v2228_v61 = vpop.f32.mrf.mxu0 }
 0x2f6   :  { %v2045_v34 = vpop.f32.mrf.mxu1 }
 0x2f7   :  { %v2229_v37 = vadd.f32 %v2228_v61, %v2044_v30  ;;  %v2230_v1 = vpop.f32.mrf.mxu0 }
 0x2f8   :  { %v2048_v31 = vpop.f32.mrf.mxu1 }
 0x2f9   :  { %2299 = vst [vmem:[#allocation5 + $0xd8] sm:$0xff] %v2229_v37  ;;  %v2049_v62 = vadd.f32 %v3647_v20, %v2048_v31  ;;  %v2233_v38 = vpop.f32.mrf.mxu0 }
 0x2fa   :  { %v2050_v63 = vpop.f32.mrf.mxu1 }
 0x2fb   :  { %v2234_v39 = vadd.f32 %v2233_v38, %v2049_v62  ;;  %v2235_v49 = vpop.f32.mrf.mxu0 }
 0x2fc   :  { %v2051_v19 = vpop.f32.mrf.mxu1 }
 0x2fd   :  { %2300 = vst [vmem:[#allocation5 + $0xe0] sm:$0xff] %v2234_v39  ;;  %v2052_v53 = vadd.f32 %v3647_v20, %v2051_v19  ;;  %v2236_v35 = vpop.f32.mrf.mxu0 }
 0x2fe   :  { %v2053_v55 = vpop.f32.mrf.mxu1 }
 0x2ff   :  { %v2237_v40 = vadd.f32 %v2236_v35, %v2052_v53  ;;  %v2238_v41 = vpop.f32.mrf.mxu0 }
 0x300   :  { %v2056_v43 = vpop.f32.mrf.mxu1 }
 0x301   :  { %2301 = vst [vmem:[#allocation5 + $0xe8] sm:$0xff] %v2237_v40  ;;  %v2057_v44 = vadd.f32 %v3647_v20, %v2056_v43  ;;  %v2241_v47 = vpop.f32.mrf.mxu0 }
 0x302   :  { %v2058_v21 = vpop.f32.mrf.mxu1 }
 0x303   :  { %v2242_v46 = vadd.f32 %v2241_v47, %v2057_v44  ;;  %v2243_v32 = vpop.f32.mrf.mxu0 }
 0x304   :  { %v2059_v48 = vpop.f32.mrf.mxu1 }
 0x305   :  { %2302 = vst [vmem:[#allocation5 + $0xf0] sm:$0xff] %v2242_v46  ;;  %v2060_v0 = vadd.f32 %v3647_v20, %v2059_v48  ;;  %v2244_v50 = vpop.f32.mrf.mxu0 }
 0x306   :  { %v2061_v51 = vpop.f32.mrf.mxu1 }
 0x307   :  { %v2245_v52 = vadd.f32 %v2244_v50, %v2060_v0  ;;  %v2246_v42 = vpop.f32.mrf.mxu0 }
 0x308   :  { %v2064_v54 = vpop.f32.mrf.mxu1 }
 0x309   :  { %2303 = vst [vmem:[#allocation5 + $0xf8] sm:$0xff] %v2245_v52  ;;  %v2065_v15 = vadd.f32 %v3647_v20, %v2064_v54  ;;  %v2249_v12 = vpop.f32.mrf.mxu0 }
 0x30a   :  { %v2066_v56 = vpop.f32.mrf.mxu1 }
 0x30b   :  { %v2250_v57 = vadd.f32 %v2249_v12, %v2065_v15  ;;  %v2251_v25 = vpop.f32.mrf.mxu0 }
 0x30c   :  { %v2067_v60 = vpop.f32.mrf.mxu1 }
 0x30d   :  { %2304 = vst [vmem:[#allocation5 + $0x100] sm:$0xff] %v2250_v57  ;;  %v2068_v13 = vadd.f32 %v3647_v20, %v2067_v60  ;;  %v2252_v9 = vpop.f32.mrf.mxu0 }
 0x30e   :  { %v2069_v3 = vpop.f32.mrf.mxu1 }
 0x30f   :  { %v2253_v36 = vadd.f32 %v2252_v9, %v2068_v13  ;;  %v2254_v4 = vpop.f32.mrf.mxu0 }
 0x310   :  { %v2072_v5 = vpop.f32.mrf.mxu1 }
 0x311   :  { %2305 = vst [vmem:[#allocation5 + $0x108] sm:$0xff] %v2253_v36  ;;  %v2073_v33 = vadd.f32 %v3647_v20, %v2072_v5  ;;  %v2257_v8 = vpop.f32.mrf.mxu0 }
 0x312   :  { %v2074_v10 = vpop.f32.mrf.mxu1 }
 0x313   :  { %v2258_v14 = vadd.f32 %v2257_v8, %v2073_v33  ;;  %v2259_v6 = vpop.f32.mrf.mxu0 }
 0x314   :  { %v2075_v7 = vpop.f32.mrf.mxu1 }
 0x315   :  { %2306 = vst [vmem:[#allocation5 + $0x110] sm:$0xff] %v2258_v14  ;;  %v2076_v16 = vadd.f32 %v3647_v20, %v2075_v7  ;;  %v2260_v18 = vpop.f32.mrf.mxu0 }
 0x316   :  { %v2077_v45 = vpop.f32.mrf.mxu1 }
 0x317   :  { %v2261_v22 = vadd.f32 %v2260_v18, %v2076_v16  ;;  %v2262_v59 = vpop.f32.mrf.mxu0 }
 0x318   :  { %v2080_v23 = vpop.f32.mrf.mxu1 }
 0x319   :  { %2307 = vst [vmem:[#allocation5 + $0x118] sm:$0xff] %v2261_v22  ;;  %v2081_v2 = vadd.f32 %v3647_v20, %v2080_v23  ;;  %v2265_v26 = vpop.f32.mrf.mxu0 }
 0x31a   :  { %v2082_v11 = vpop.f32.mrf.mxu1 }
 0x31b   :  { %v2266_v58 = vadd.f32 %v2265_v26, %v2081_v2  ;;  %v2267_v24 = vpop.f32.mrf.mxu0 }
 0x31c   :  { %v2083_v17 = vpop.f32.mrf.mxu1 }
 0x31d   :  { %2308 = vst [vmem:[#allocation5 + $0x120] sm:$0xff] %v2266_v58  ;;  %v2084_v27 = vadd.f32 %v3647_v20, %v2083_v17  ;;  %v2268_v28 = vpop.f32.mrf.mxu0 }
 0x31e   :  { %v2085_v29 = vpop.f32.mrf.mxu1 }
 0x31f   :  { %v2269_v30 = vadd.f32 %v2268_v28, %v2084_v27  ;;  %v2270_v61 = vpop.f32.mrf.mxu0 }
 0x321   :  { %2309 = vst [vmem:[#allocation5 + $0x128] sm:$0xf] %v2269_v30 }
 0x322   :  { %2942 = shalt.err (!%p2939_p9)
}
 0x323   :  { %s2960_s3 = smov 128   ;;  %s2961_s14 = smov 8  }
 0x324   :  { %2321 = dma.vmem_to_hbm [thread:$0]  %s2316_s12, 4864, %s3697_s7, [#allocation4], %s2960_s3, %s2960_s3, %s2961_s14  }
 0x325   :  { %2953 = dma.done.wait [#allocation4], 4864  }
 0x326   :  { %2954 = vsyncadd [#allocation4], 4294962432 }
 0x327   :  { %2325 = vsyncpa [#allocation3], 1 }
 0x328   :  { %2326 = vsyncpa [#allocation4], 1 }

</bundles_post_ra>
